<compile_context>
chip_gen: v7x
topology: tpu7x:2x2x1
jax: 0.10.0
libtpu: 0.0.40
codegen_flags: <defaults>
</compile_context>

<pallas_src>
import jax
import jax.numpy as jnp
from jax import lax
from jax.experimental import pallas as pl
from jax.experimental.pallas import tpu as pltpu


def _round_up(x, m):
    return (x + m - 1) // m * m


def dense_supervision_kernel(
    x_ref,                       # (2, 2*TH, Wo, Cin) bf16  [0]=even src cols, [1]=odd src cols
    halo_ref,                    # (2, 1, Wo, Cin)    bf16  src row 2*TH*r-1 (clamped; unused at r==0)
    sc_l_ref, sh_l_ref,          # (1, Cin)  f32  left BN (folded)
    sc_r1_ref, sh_r1_ref,        # (1, Cin)  f32  right BN #1 (folded)
    sc_r2_ref, sh_r2_ref,        # (1, Cmid) f32  right BN #2 (folded)
    w_l_ref,                     # (Cin, Cmid)     bf16  left 1x1
    w_r1_ref,                    # (Cin, Cmid)     bf16  right 1x1
    w_r9_ref,                    # (9*Cmid, Cmid)  bf16  right 3x3 (im2col layout, (ky,kx,ci) x co)
    out_ref,                     # (TH, Wo, 2*Cmid) bf16
    b_ee_ref,                    # scratch (TH+1, W_e, Cmid) bf16  padded (even row, even col)
    b_eo_ref,                    # scratch (TH+1, W_o, Cmid) bf16  padded (even row, odd  col)
    b_oe_ref,                    # scratch (TH,   W_e, Cmid) bf16  padded (odd  row, even col)
    b_oo_ref,                    # scratch (TH,   W_o, Cmid) bf16  padded (odd  row, odd  col)
):
    _, H_blk, Wo, Cin = x_ref.shape
    TH = H_blk // 2
    Cmid = w_l_ref.shape[1]
    f32, bf16 = jnp.float32, jnp.bfloat16
    r = pl.program_id(1)

    x_all = x_ref[...]                                     # (2, 2*TH, Wo, Cin)

    # ------------- left: 2x2 maxpool (bf16) -> BN -> ReLU -> 1x1 ------------
    cm = jnp.maximum(x_all[0], x_all[1]).reshape(TH, 2, Wo, Cin)
    pooled = jnp.maximum(cm[:, 0], cm[:, 1]).astype(f32).reshape(TH * Wo, Cin)
    yl = jnp.maximum(pooled * sc_l_ref[...] + sh_l_ref[...], 0.0).astype(bf16)
    left = jnp.dot(yl, w_l_ref[...], preferred_element_type=f32)
    out_ref[:, :, 0:Cmid] = left.reshape(TH, Wo, Cmid).astype(out_ref.dtype)

    # ------- right stage 1: BN -> ReLU -> 1x1 -> BN -> ReLU (one matmul) ----
    sc1, sh1 = sc_r1_ref[...], sh_r1_ref[...]
    sc2, sh2 = sc_r2_ref[...], sh_r2_ref[...]
    w1 = w_r1_ref[...]

    a = x_all.astype(f32).reshape(2 * 2 * TH * Wo, Cin)
    a = jnp.maximum(a * sc1 + sh1, 0.0).astype(bf16)
    r1 = jnp.dot(a, w1, preferred_element_type=f32)
    r2 = jnp.maximum(r1 * sc2 + sh2, 0.0).astype(bf16)
    s4 = r2.reshape(2, 2 * TH, Wo, Cmid)
    s_e = s4[0].reshape(TH, 2, Wo, Cmid)                   # even source cols, row parity split
    s_o = s4[1].reshape(TH, 2, Wo, Cmid)                   # odd  source cols

    # scatter row parities into the 4 phase buffers (padded-grid coordinates)
    b_oo_ref[0:TH, 0:Wo, :] = s_e[:, 0]                    # (odd  row, odd  col)
    b_eo_ref[1:TH + 1, 0:Wo, :] = s_e[:, 1]                # (even row, odd  col)
    b_oe_ref[0:TH, 1:Wo + 1, :] = s_o[:, 0]                # (odd  row, even col)
    b_ee_ref[1:TH + 1, 1:Wo + 1, :] = s_o[:, 1]            # (even row, even col)

    # zero the top halo row and left pad column (only the thin halo)
    W_ee = b_ee_ref.shape[1]
    W_eo = b_eo_ref.shape[1]
    b_ee_ref[0:1, :, :] = jnp.zeros((1, W_ee, Cmid), bf16)
    b_eo_ref[0:1, :, :] = jnp.zeros((1, W_eo, Cmid), bf16)
    b_ee_ref[:, 0:1, :] = jnp.zeros((TH + 1, 1, Cmid), bf16)
    b_oe_ref[:, 0:1, :] = jnp.zeros((TH, 1, Cmid), bf16)

    # dy=0 halo row: stage-1 of the last source row of the previous row block
    @pl.when(r > 0)
    def _():
        h = halo_ref[...].astype(f32).reshape(2 * Wo, Cin)
        h = jnp.maximum(h * sc1 + sh1, 0.0).astype(bf16)
        h1 = jnp.dot(h, w1, preferred_element_type=f32)
        h2 = jnp.maximum(h1 * sc2 + sh2, 0.0).astype(bf16).reshape(2, Wo, Cmid)
        b_eo_ref[0:1, 0:Wo, :] = h2[0:1]                   # even src cols -> odd  padded cols
        b_ee_ref[0:1, 1:Wo + 1, :] = h2[1:2]               # odd  src cols -> even padded cols

    # -- 3x3 stride-2 conv: nine accumulating (TH*Wo,Cmid)@(Cmid,Cmid) dots --
    # tap order is (dy, dx) row-major, matching w_r3.reshape(9*Cmid, Cmid)
    taps = [
        b_ee_ref[0:TH, 0:Wo, :],              # (0, 0)
        b_eo_ref[0:TH, 0:Wo, :],              # (0, 1)
        b_ee_ref[0:TH, 1:Wo + 1, :],          # (0, 2)
        b_oe_ref[0:TH, 0:Wo, :],              # (1, 0)
        b_oo_ref[0:TH, 0:Wo, :],              # (1, 1)
        b_oe_ref[0:TH, 1:Wo + 1, :],          # (1, 2)
        b_ee_ref[1:TH + 1, 0:Wo, :],          # (2, 0)
        b_eo_ref[1:TH + 1, 0:Wo, :],          # (2, 1)
        b_ee_ref[1:TH + 1, 1:Wo + 1, :],      # (2, 2)
    ]
    acc = jnp.zeros((TH * Wo, Cmid), f32)
    for t, tap in enumerate(taps):
        acc = acc + jnp.dot(tap.reshape(TH * Wo, Cmid),
                            w_r9_ref[t * Cmid:(t + 1) * Cmid, :],
                            preferred_element_type=f32)
    out_ref[:, :, Cmid:2 * Cmid] = acc.reshape(TH, Wo, Cmid).astype(out_ref.dtype)


def _bn_fold(gamma, beta, mean, var, eps=1e-5):
    scale = gamma / jnp.sqrt(var + eps)
    shift = beta - mean * scale
    return (scale.reshape(1, -1).astype(jnp.float32),
            shift.reshape(1, -1).astype(jnp.float32))


def _pick_row_block(Ho, Wo, Cin, Cmid, budget_bytes=12 << 20):
    """Output-row block size: as big as a ~12 MiB working set allows, >=2 blocks."""
    per_row = (2 * 2 * Wo * Cin * 2 * 2          # x block, bf16, double-buffered
               + Wo * 2 * Cmid * 2 * 2           # out block, bf16, double-buffered
               + 4 * Wo * Cmid * 2               # bf16 phase scratch
               + 4 * Wo * Cmid * 4               # stage-1 f32 intermediate
               + 4 * Wo * (Cin + Cmid) * 2 * 2   # stage-1 bf16 temporaries
               + 2 * Wo * Cmid * 4)              # accumulators / left branch
    th = max(1, min(Ho, budget_bytes // max(per_row, 1)))
    if Ho >= 2:                                  # >=2 row blocks: pipeline DMA, feed both v7x TCs
        th = min(th, max(1, Ho // 2))
    while Ho % th:                               # must divide Ho exactly
        th -= 1
    return int(th)


def dense_supervision(x_nchw, params):
    """x_nchw: (N, Cin, H, W). Returns (N, 2*outC, H//2, W//2) matching PyTorch."""
    N, Cin, H, W = x_nchw.shape
    Cmid = params["w_l"].shape[1]
    assert H % 2 == 0 and W % 2 == 0  # TODO(synk): ceil_mode padding for odd H/W
    Ho, Wo = H // 2, W // 2

    bf16 = jnp.bfloat16
    x = jnp.transpose(x_nchw, (0, 2, 3, 1)).astype(bf16)          # NHWC, bf16
    # one-time even/odd column phase split, stacked: (N, 2, H, Wo, Cin)
    x2 = jnp.stack([x[:, :, 0::2, :], x[:, :, 1::2, :]], axis=1)

    sc_l, sh_l = _bn_fold(*params["bn_l"])
    sc_r1, sh_r1 = _bn_fold(*params["bn_r1"])
    sc_r2, sh_r2 = _bn_fold(*params["bn_r2"])
    w_l = params["w_l"].astype(bf16)
    w_r1 = params["w_r1"].astype(bf16)
    w_r9 = params["w_r3"].astype(bf16).reshape(9 * Cmid, Cmid)    # (ky,kx,ci) x co

    TH = _pick_row_block(Ho, Wo, Cin, Cmid)
    R = Ho // TH
    W_e = _round_up(Wo + 1, 8)       # sublane-padded scratch widths (valid region at front)
    W_o = _round_up(Wo, 8)

    def rep_spec(shape):             # replicated operand (same block every grid step)
        return pl.BlockSpec(shape, lambda b, r: (0,) * len(shape))

    # ---- generation-aware VMEM limit (blocks + scratch + in-kernel temps) --
    try:
        phys = int(pltpu.get_tpu_info().vmem_capacity_bytes)
    except Exception:
        phys = 64 << 20              # conservative fallback (v7x-sized)
    cap = int(phys * 0.8)
    blk_in = 2 * (2 * 2 * TH * Wo * Cin * 2 + 2 * Wo * Cin * 2)   # main + halo, dbuf, bf16
    blk_out = 2 * (TH * Wo * 2 * Cmid * 2)                        # bf16, dbuf
    blk_w = 2 * ((2 * Cin * Cmid + 9 * Cmid * Cmid) * 2 + (4 * Cin + 2 * Cmid) * 4)
    scratch = ((TH + 1) * (W_e + W_o) + TH * (W_e + W_o)) * Cmid * 2
    temps = (4 * TH * Wo * (Cin * (4 + 2) + Cmid * (4 + 2 + 2))   # stage-1 a/r1/r2/s
             + TH * Wo * Cmid * 4 * 3)                            # acc + left + pool temps
    est = blk_in + blk_out + blk_w + scratch + temps
    vmem_limit = int(min(cap, max(2 * est, 24 << 20)))

    out_nhwc = pl.pallas_call(
        dense_supervision_kernel,
        out_shape=jax.ShapeDtypeStruct((N, Ho, Wo, 2 * Cmid), bf16),
        grid_spec=pltpu.PrefetchScalarGridSpec(
            num_scalar_prefetch=0,
            grid=(N, R),
            in_specs=[
                # main row block: 2*TH source rows, both column phases
                pl.BlockSpec((None, 2, 2 * TH, Wo, Cin),
                             lambda b, r: (b, 0, r, 0, 0)),
                # 1-source-row halo (last row of previous block; clamped at r==0)
                pl.BlockSpec((None, 2, 1, Wo, Cin),
                             lambda b, r: (b, 0, jnp.maximum(2 * TH * r - 1, 0), 0, 0)),
                rep_spec((1, Cin)), rep_spec((1, Cin)),
                rep_spec((1, Cin)), rep_spec((1, Cin)),
                rep_spec((1, Cmid)), rep_spec((1, Cmid)),
                rep_spec((Cin, Cmid)),
                rep_spec((Cin, Cmid)),
                rep_spec((9 * Cmid, Cmid)),
            ],
            out_specs=pl.BlockSpec((None, TH, Wo, 2 * Cmid), lambda b, r: (b, r, 0, 0)),
            scratch_shapes=[
                pltpu.VMEM((TH + 1, W_e, Cmid), bf16),
                pltpu.VMEM((TH + 1, W_o, Cmid), bf16),
                pltpu.VMEM((TH, W_e, Cmid), bf16),
                pltpu.VMEM((TH, W_o, Cmid), bf16),
            ],
        ),
        compiler_params=pltpu.CompilerParams(
            dimension_semantics=("parallel", "parallel"),   # blocks are fully independent
            vmem_limit_bytes=vmem_limit,
        ),
    )(x2, x2, sc_l, sh_l, sc_r1, sh_r1, sc_r2, sh_r2, w_l, w_r1, w_r9)

    return jnp.transpose(out_nhwc, (0, 3, 1, 2)).astype(jnp.float32)   # back to NCHW f32


def init_params(key, inC, outC=128):
    ks = jax.random.split(key, 6)

    def bn(k, c):
        gamma = jax.random.uniform(k, (c,), jnp.float32, 0.5, 1.5)
        beta = 0.1 * jax.random.normal(jax.random.fold_in(k, 1), (c,), jnp.float32)
        mean = 0.1 * jax.random.normal(jax.random.fold_in(k, 2), (c,), jnp.float32)
        var = jax.random.uniform(jax.random.fold_in(k, 3), (c,), jnp.float32, 0.5, 1.5)
        return (gamma, beta, mean, var)

    return {
        "bn_l": bn(ks[0], inC),
        "bn_r1": bn(ks[1], inC),
        "bn_r2": bn(ks[2], outC),
        "w_l": 0.1 * jax.random.normal(ks[3], (inC, outC), jnp.float32),    # (Cin, Cout)
        "w_r1": 0.1 * jax.random.normal(ks[4], (inC, outC), jnp.float32),   # (Cin, Cout)
        "w_r3": 0.05 * jax.random.normal(ks[5], (3, 3, outC, outC), jnp.float32),  # (kh,kw,Cin,Cout)
    }


def reference(x, params, eps=1e-5):
    """Pure-JAX NCHW f32 reference (BatchNorm in inference mode)."""
    def bn(y, p):
        g, b, m, v = (t.reshape(1, -1, 1, 1) for t in p)
        return (y - m) / jnp.sqrt(v + eps) * g + b

    relu = lambda y: jnp.maximum(y, 0.0)
    dn = ("NCHW", "OIHW", "NCHW")
    hi = lax.Precision.HIGHEST

    pooled = lax.reduce_window(x, -jnp.inf, lax.max, (1, 1, 2, 2), (1, 1, 2, 2), "VALID")
    wl = jnp.transpose(params["w_l"])[:, :, None, None]
    left = lax.conv_general_dilated(relu(bn(pooled, params["bn_l"])), wl, (1, 1),
                                    "VALID", dimension_numbers=dn, precision=hi)

    wr1 = jnp.transpose(params["w_r1"])[:, :, None, None]
    r1 = lax.conv_general_dilated(relu(bn(x, params["bn_r1"])), wr1, (1, 1),
                                  "VALID", dimension_numbers=dn, precision=hi)
    wr3 = jnp.transpose(params["w_r3"], (3, 2, 0, 1))
    right = lax.conv_general_dilated(relu(bn(r1, params["bn_r2"])), wr3, (2, 2),
                                     ((1, 1), (1, 1)), dimension_numbers=dn, precision=hi)
    return jnp.concatenate([left, right], axis=1)


if __name__ == "__main__":
    key = jax.random.PRNGKey(0)
    kx, kp = jax.random.split(key)

    # NOTE: toy shape for the correctness check (review: tune tiles at Cin>=128,
    # H,W>=64 production shapes; Ho=8 -> TH=4 here so the halo path is exercised).
    N, inC, H, W = 2, 8, 16, 16
    outC = 128

    x = jax.random.normal(kx, (N, inC, H, W), jnp.float32)
    params = init_params(kp, inC, outC)

    y = jax.block_until_ready(dense_supervision(x, params))
    assert y.shape == (N, 2 * outC, H // 2, W // 2), y.shape

    y_ref = reference(x, params)
    err = float(jnp.max(jnp.abs(y - y_ref)))
    # bf16 activations/weights/output (f32 MXU accumulation) vs f32-HIGHEST reference
    assert err < 4e-2, f"max abs err {err}"

    print("KERNEL_OK")
</pallas_src>

<mosaic_0001>
module attributes {stable_mosaic.version = 11 : i64} {
  func.func @dense_supervision_kernel(%arg0: i32, %arg1: i32, %arg2: memref<1x2x8x8x8xbf16, #tpu.memory_space<vmem>>, %arg3: memref<1x2x1x8x8xbf16, #tpu.memory_space<vmem>>, %arg4: memref<1x8xf32, #tpu.memory_space<vmem>>, %arg5: memref<1x8xf32, #tpu.memory_space<vmem>>, %arg6: memref<1x8xf32, #tpu.memory_space<vmem>>, %arg7: memref<1x8xf32, #tpu.memory_space<vmem>>, %arg8: memref<1x128xf32, #tpu.memory_space<vmem>>, %arg9: memref<1x128xf32, #tpu.memory_space<vmem>>, %arg10: memref<8x128xbf16, #tpu.memory_space<vmem>>, %arg11: memref<8x128xbf16, #tpu.memory_space<vmem>>, %arg12: memref<1152x128xbf16, #tpu.memory_space<vmem>>, %arg13: memref<1x4x8x256xbf16, #tpu.memory_space<vmem>>, %arg14: memref<5x16x128xbf16, #tpu.memory_space<vmem>>, %arg15: memref<5x8x128xbf16, #tpu.memory_space<vmem>>, %arg16: memref<4x16x128xbf16, #tpu.memory_space<vmem>>, %arg17: memref<4x8x128xbf16, #tpu.memory_space<vmem>>) attributes {dimension_semantics = [#tpu.dimension_semantics<parallel>, #tpu.dimension_semantics<parallel>], iteration_bounds = array<i64: 2, 2>, scalar_prefetch = 0 : i64, scratch_operands = 4 : i64, tpu.core_type = #tpu.core_type<tc>, window_params = [{transform_indices = @transform_0, window_bounds = array<i64: 1, 2, 8, 8, 8>}, {transform_indices = @transform_1, window_bounds = array<i64: 1, 2, 1, 8, 8>}, {pipeline_mode = #tpu.pipeline_mode<synchronous>, transform_indices = @transform_2, window_bounds = array<i64: 1, 8>}, {pipeline_mode = #tpu.pipeline_mode<synchronous>, transform_indices = @transform_3, window_bounds = array<i64: 1, 8>}, {pipeline_mode = #tpu.pipeline_mode<synchronous>, transform_indices = @transform_4, window_bounds = array<i64: 1, 8>}, {pipeline_mode = #tpu.pipeline_mode<synchronous>, transform_indices = @transform_5, window_bounds = array<i64: 1, 8>}, {pipeline_mode = #tpu.pipeline_mode<synchronous>, transform_indices = @transform_6, window_bounds = array<i64: 1, 128>}, {pipeline_mode = #tpu.pipeline_mode<synchronous>, transform_indices = @transform_7, window_bounds = array<i64: 1, 128>}, {pipeline_mode = #tpu.pipeline_mode<synchronous>, transform_indices = @transform_8, window_bounds = array<i64: 8, 128>}, {pipeline_mode = #tpu.pipeline_mode<synchronous>, transform_indices = @transform_9, window_bounds = array<i64: 8, 128>}, {pipeline_mode = #tpu.pipeline_mode<synchronous>, transform_indices = @transform_10, window_bounds = array<i64: 1152, 128>}, {transform_indices = @transform_11, window_bounds = array<i64: 1, 4, 8, 256>}]} {
    %c0 = arith.constant 0 : index
    %c0_0 = arith.constant 0 : index
    %c0_1 = arith.constant 0 : index
    %c0_2 = arith.constant 0 : index
    %c0_3 = arith.constant 0 : index
    %0 = vector.load %arg2[%c0, %c0_0, %c0_1, %c0_2, %c0_3] : memref<1x2x8x8x8xbf16, #tpu.memory_space<vmem>>, vector<1x2x8x8x8xbf16>
    %1 = vector.shape_cast %0 : vector<1x2x8x8x8xbf16> to vector<2x8x8x8xbf16>
    %2 = vector.extract_strided_slice %1 {offsets = [0, 0, 0, 0], sizes = [1, 8, 8, 8], strides = [1, 1, 1, 1]} : vector<2x8x8x8xbf16> to vector<1x8x8x8xbf16>
    %3 = vector.shape_cast %2 : vector<1x8x8x8xbf16> to vector<8x8x8xbf16>
    %4 = vector.extract_strided_slice %1 {offsets = [1, 0, 0, 0], sizes = [1, 8, 8, 8], strides = [1, 1, 1, 1]} : vector<2x8x8x8xbf16> to vector<1x8x8x8xbf16>
    %5 = vector.shape_cast %4 : vector<1x8x8x8xbf16> to vector<8x8x8xbf16>
    %6 = arith.maximumf %3, %5 : vector<8x8x8xbf16>
    %7 = vector.shape_cast %6 : vector<8x8x8xbf16> to vector<4x2x8x8xbf16>
    %8 = vector.extract_strided_slice %7 {offsets = [0, 0, 0, 0], sizes = [4, 1, 8, 8], strides = [1, 1, 1, 1]} : vector<4x2x8x8xbf16> to vector<4x1x8x8xbf16>
    %9 = vector.shape_cast %8 : vector<4x1x8x8xbf16> to vector<4x8x8xbf16>
    %10 = vector.extract_strided_slice %7 {offsets = [0, 1, 0, 0], sizes = [4, 1, 8, 8], strides = [1, 1, 1, 1]} : vector<4x2x8x8xbf16> to vector<4x1x8x8xbf16>
    %11 = vector.shape_cast %10 : vector<4x1x8x8xbf16> to vector<4x8x8xbf16>
    %12 = arith.maximumf %9, %11 : vector<4x8x8xbf16>
    %13 = arith.extf %12 : vector<4x8x8xbf16> to vector<4x8x8xf32>
    %14 = vector.shape_cast %13 : vector<4x8x8xf32> to vector<32x8xf32>
    %c0_4 = arith.constant 0 : index
    %c0_5 = arith.constant 0 : index
    %15 = vector.load %arg4[%c0_4, %c0_5] : memref<1x8xf32, #tpu.memory_space<vmem>>, vector<1x8xf32>
    %16 = vector.broadcast %15 : vector<1x8xf32> to vector<32x8xf32>
    %17 = arith.mulf %14, %16 : vector<32x8xf32>
    %c0_6 = arith.constant 0 : index
    %c0_7 = arith.constant 0 : index
    %18 = vector.load %arg5[%c0_6, %c0_7] : memref<1x8xf32, #tpu.memory_space<vmem>>, vector<1x8xf32>
    %19 = vector.broadcast %18 : vector<1x8xf32> to vector<32x8xf32>
    %20 = arith.addf %17, %19 : vector<32x8xf32>
    %cst = arith.constant 0.000000e+00 : f32
    %21 = vector.broadcast %cst : f32 to vector<32x8xf32>
    %22 = arith.maximumf %20, %21 : vector<32x8xf32>
    %23 = arith.truncf %22 : vector<32x8xf32> to vector<32x8xbf16>
    %c0_8 = arith.constant 0 : index
    %c0_9 = arith.constant 0 : index
    %24 = vector.load %arg10[%c0_8, %c0_9] : memref<8x128xbf16, #tpu.memory_space<vmem>>, vector<8x128xbf16>
    %cst_10 = arith.constant dense<0.000000e+00> : vector<32x128xf32>
    %25 = tpu.matmul %23, %24, %cst_10 {dimension_numbers = #tpu.dot_dimension_numbers<[1], [0], [0], [1], [0, 0, 1, 1], [], []>} : vector<32x8xbf16>, vector<8x128xbf16>, vector<32x128xf32> -> vector<32x128xf32>
    %26 = vector.shape_cast %25 : vector<32x128xf32> to vector<4x8x128xf32>
    %27 = arith.truncf %26 : vector<4x8x128xf32> to vector<4x8x128xbf16>
    %c0_11 = arith.constant 0 : index
    %c0_12 = arith.constant 0 : index
    %c0_13 = arith.constant 0 : index
    %c0_14 = arith.constant 0 : index
    %28 = vector.load %arg13[%c0_11, %c0_12, %c0_13, %c0_14] : memref<1x4x8x256xbf16, #tpu.memory_space<vmem>>, vector<1x4x8x128xbf16>
    %29 = vector.shape_cast %28 : vector<1x4x8x128xbf16> to vector<4x8x128xbf16>
    %30 = vector.shape_cast %27 : vector<4x8x128xbf16> to vector<1x4x8x128xbf16>
    tpu.vector_store %arg13[%c0_11, %c0_12, %c0_13, %c0_14], %30 {strides = array<i32>} : memref<1x4x8x256xbf16, #tpu.memory_space<vmem>>, vector<1x4x8x128xbf16>,
    %c0_15 = arith.constant 0 : index
    %c0_16 = arith.constant 0 : index
    %31 = vector.load %arg6[%c0_15, %c0_16] : memref<1x8xf32, #tpu.memory_space<vmem>>, vector<1x8xf32>
    %c0_17 = arith.constant 0 : index
    %c0_18 = arith.constant 0 : index
    %32 = vector.load %arg7[%c0_17, %c0_18] : memref<1x8xf32, #tpu.memory_space<vmem>>, vector<1x8xf32>
    %c0_19 = arith.constant 0 : index
    %c0_20 = arith.constant 0 : index
    %33 = vector.load %arg8[%c0_19, %c0_20] : memref<1x128xf32, #tpu.memory_space<vmem>>, vector<1x128xf32>
    %c0_21 = arith.constant 0 : index
    %c0_22 = arith.constant 0 : index
    %34 = vector.load %arg9[%c0_21, %c0_22] : memref<1x128xf32, #tpu.memory_space<vmem>>, vector<1x128xf32>
    %c0_23 = arith.constant 0 : index
    %c0_24 = arith.constant 0 : index
    %35 = vector.load %arg11[%c0_23, %c0_24] : memref<8x128xbf16, #tpu.memory_space<vmem>>, vector<8x128xbf16>
    %36 = arith.extf %1 : vector<2x8x8x8xbf16> to vector<2x8x8x8xf32>
    %37 = vector.shape_cast %36 : vector<2x8x8x8xf32> to vector<128x8xf32>
    %38 = vector.broadcast %31 : vector<1x8xf32> to vector<128x8xf32>
    %39 = arith.mulf %37, %38 : vector<128x8xf32>
    %40 = vector.broadcast %32 : vector<1x8xf32> to vector<128x8xf32>
    %41 = arith.addf %39, %40 : vector<128x8xf32>
    %cst_25 = arith.constant 0.000000e+00 : f32
    %42 = vector.broadcast %cst_25 : f32 to vector<128x8xf32>
    %43 = arith.maximumf %41, %42 : vector<128x8xf32>
    %44 = arith.truncf %43 : vector<128x8xf32> to vector<128x8xbf16>
    %cst_26 = arith.constant dense<0.000000e+00> : vector<128x128xf32>
    %45 = tpu.matmul %44, %35, %cst_26 {dimension_numbers = #tpu.dot_dimension_numbers<[1], [0], [0], [1], [0, 0, 1, 1], [], []>} : vector<128x8xbf16>, vector<8x128xbf16>, vector<128x128xf32> -> vector<128x128xf32>
    %46 = vector.broadcast %33 : vector<1x128xf32> to vector<128x128xf32>
    %47 = arith.mulf %45, %46 : vector<128x128xf32>
    %48 = vector.broadcast %34 : vector<1x128xf32> to vector<128x128xf32>
    %49 = arith.addf %47, %48 : vector<128x128xf32>
    %cst_27 = arith.constant 0.000000e+00 : f32
    %50 = vector.broadcast %cst_27 : f32 to vector<128x128xf32>
    %51 = arith.maximumf %49, %50 : vector<128x128xf32>
    %52 = arith.truncf %51 : vector<128x128xf32> to vector<128x128xbf16>
    %53 = vector.shape_cast %52 : vector<128x128xbf16> to vector<2x8x8x128xbf16>
    %54 = vector.extract_strided_slice %53 {offsets = [0, 0, 0, 0], sizes = [1, 8, 8, 128], strides = [1, 1, 1, 1]} : vector<2x8x8x128xbf16> to vector<1x8x8x128xbf16>
    %55 = vector.shape_cast %54 : vector<1x8x8x128xbf16> to vector<8x8x128xbf16>
    %56 = vector.shape_cast %55 : vector<8x8x128xbf16> to vector<4x2x8x128xbf16>
    %57 = vector.extract_strided_slice %53 {offsets = [1, 0, 0, 0], sizes = [1, 8, 8, 128], strides = [1, 1, 1, 1]} : vector<2x8x8x128xbf16> to vector<1x8x8x128xbf16>
    %58 = vector.shape_cast %57 : vector<1x8x8x128xbf16> to vector<8x8x128xbf16>
    %59 = vector.shape_cast %58 : vector<8x8x128xbf16> to vector<4x2x8x128xbf16>
    %60 = vector.extract_strided_slice %56 {offsets = [0, 0, 0, 0], sizes = [4, 1, 8, 128], strides = [1, 1, 1, 1]} : vector<4x2x8x128xbf16> to vector<4x1x8x128xbf16>
    %61 = vector.shape_cast %60 : vector<4x1x8x128xbf16> to vector<4x8x128xbf16>
    %c0_28 = arith.constant 0 : index
    %c0_29 = arith.constant 0 : index
    %c0_30 = arith.constant 0 : index
    %62 = vector.load %arg17[%c0_28, %c0_29, %c0_30] : memref<4x8x128xbf16, #tpu.memory_space<vmem>>, vector<4x8x128xbf16>
    tpu.vector_store %arg17[%c0_28, %c0_29, %c0_30], %61 {strides = array<i32>} : memref<4x8x128xbf16, #tpu.memory_space<vmem>>, vector<4x8x128xbf16>,
    %63 = vector.extract_strided_slice %56 {offsets = [0, 1, 0, 0], sizes = [4, 1, 8, 128], strides = [1, 1, 1, 1]} : vector<4x2x8x128xbf16> to vector<4x1x8x128xbf16>
    %64 = vector.shape_cast %63 : vector<4x1x8x128xbf16> to vector<4x8x128xbf16>
    %c1 = arith.constant 1 : index
    %c0_31 = arith.constant 0 : index
    %c0_32 = arith.constant 0 : index
    %65 = vector.load %arg15[%c1, %c0_31, %c0_32] : memref<5x8x128xbf16, #tpu.memory_space<vmem>>, vector<4x8x128xbf16>
    tpu.vector_store %arg15[%c1, %c0_31, %c0_32], %64 {strides = array<i32>} : memref<5x8x128xbf16, #tpu.memory_space<vmem>>, vector<4x8x128xbf16>,
    %66 = vector.extract_strided_slice %59 {offsets = [0, 0, 0, 0], sizes = [4, 1, 8, 128], strides = [1, 1, 1, 1]} : vector<4x2x8x128xbf16> to vector<4x1x8x128xbf16>
    %67 = vector.shape_cast %66 : vector<4x1x8x128xbf16> to vector<4x8x128xbf16>
    %c0_33 = arith.constant 0 : index
    %c1_34 = arith.constant 1 : index
    %c0_35 = arith.constant 0 : index
    %68 = vector.load %arg16[%c0_33, %c1_34, %c0_35] : memref<4x16x128xbf16, #tpu.memory_space<vmem>>, vector<4x8x128xbf16>
    tpu.vector_store %arg16[%c0_33, %c1_34, %c0_35], %67 {strides = array<i32>} : memref<4x16x128xbf16, #tpu.memory_space<vmem>>, vector<4x8x128xbf16>,
    %69 = vector.extract_strided_slice %59 {offsets = [0, 1, 0, 0], sizes = [4, 1, 8, 128], strides = [1, 1, 1, 1]} : vector<4x2x8x128xbf16> to vector<4x1x8x128xbf16>
    %70 = vector.shape_cast %69 : vector<4x1x8x128xbf16> to vector<4x8x128xbf16>
    %c1_36 = arith.constant 1 : index
    %c1_37 = arith.constant 1 : index
    %c0_38 = arith.constant 0 : index
    %71 = vector.load %arg14[%c1_36, %c1_37, %c0_38] : memref<5x16x128xbf16, #tpu.memory_space<vmem>>, vector<4x8x128xbf16>
    tpu.vector_store %arg14[%c1_36, %c1_37, %c0_38], %70 {strides = array<i32>} : memref<5x16x128xbf16, #tpu.memory_space<vmem>>, vector<4x8x128xbf16>,
    %cst_39 = arith.constant 0.000000e+00 : bf16
    %72 = vector.broadcast %cst_39 : bf16 to vector<1x16x128xbf16>
    %c0_40 = arith.constant 0 : index
    %c0_41 = arith.constant 0 : index
    %c0_42 = arith.constant 0 : index
    %73 = vector.load %arg14[%c0_40, %c0_41, %c0_42] : memref<5x16x128xbf16, #tpu.memory_space<vmem>>, vector<1x16x128xbf16>
    tpu.vector_store %arg14[%c0_40, %c0_41, %c0_42], %72 {strides = array<i32>} : memref<5x16x128xbf16, #tpu.memory_space<vmem>>, vector<1x16x128xbf16>,
    %cst_43 = arith.constant 0.000000e+00 : bf16
    %74 = vector.broadcast %cst_43 : bf16 to vector<1x8x128xbf16>
    %c0_44 = arith.constant 0 : index
    %c0_45 = arith.constant 0 : index
    %c0_46 = arith.constant 0 : index
    %75 = vector.load %arg15[%c0_44, %c0_45, %c0_46] : memref<5x8x128xbf16, #tpu.memory_space<vmem>>, vector<1x8x128xbf16>
    tpu.vector_store %arg15[%c0_44, %c0_45, %c0_46], %74 {strides = array<i32>} : memref<5x8x128xbf16, #tpu.memory_space<vmem>>, vector<1x8x128xbf16>,
    %cst_47 = arith.constant 0.000000e+00 : bf16
    %76 = vector.broadcast %cst_47 : bf16 to vector<5x1x128xbf16>
    %c0_48 = arith.constant 0 : index
    %c0_49 = arith.constant 0 : index
    %c0_50 = arith.constant 0 : index
    %77 = vector.load %arg14[%c0_48, %c0_49, %c0_50] : memref<5x16x128xbf16, #tpu.memory_space<vmem>>, vector<5x1x128xbf16>
    tpu.vector_store %arg14[%c0_48, %c0_49, %c0_50], %76 {strides = array<i32>} : memref<5x16x128xbf16, #tpu.memory_space<vmem>>, vector<5x1x128xbf16>,
    %cst_51 = arith.constant 0.000000e+00 : bf16
    %78 = vector.broadcast %cst_51 : bf16 to vector<4x1x128xbf16>
    %c0_52 = arith.constant 0 : index
    %c0_53 = arith.constant 0 : index
    %c0_54 = arith.constant 0 : index
    %79 = vector.load %arg16[%c0_52, %c0_53, %c0_54] : memref<4x16x128xbf16, #tpu.memory_space<vmem>>, vector<4x1x128xbf16>
    tpu.vector_store %arg16[%c0_52, %c0_53, %c0_54], %78 {strides = array<i32>} : memref<4x16x128xbf16, #tpu.memory_space<vmem>>, vector<4x1x128xbf16>,
    %c0_i32 = arith.constant 0 : i32
    %80 = arith.cmpi sgt, %arg1, %c0_i32 : i32
    %81 = arith.extui %80 : i1 to i32
    %c0_i32_55 = arith.constant 0 : i32
    %82 = arith.cmpi ne, %81, %c0_i32_55 : i32
    scf.if %82 {
      %c0_107 = arith.constant 0 : index
      %c0_108 = arith.constant 0 : index
      %c0_109 = arith.constant 0 : index
      %c0_110 = arith.constant 0 : index
      %c0_111 = arith.constant 0 : index
      %134 = vector.load %arg3[%c0_107, %c0_108, %c0_109, %c0_110, %c0_111] : memref<1x2x1x8x8xbf16, #tpu.memory_space<vmem>>, vector<1x2x1x8x8xbf16>
      %135 = vector.shape_cast %134 : vector<1x2x1x8x8xbf16> to vector<2x1x8x8xbf16>
      %136 = arith.extf %135 : vector<2x1x8x8xbf16> to vector<2x1x8x8xf32>
      %137 = vector.shape_cast %136 : vector<2x1x8x8xf32> to vector<16x8xf32>
      %138 = vector.broadcast %31 : vector<1x8xf32> to vector<16x8xf32>
      %139 = arith.mulf %137, %138 : vector<16x8xf32>
      %140 = vector.broadcast %32 : vector<1x8xf32> to vector<16x8xf32>
      %141 = arith.addf %139, %140 : vector<16x8xf32>
      %cst_112 = arith.constant 0.000000e+00 : f32
      %142 = vector.broadcast %cst_112 : f32 to vector<16x8xf32>
      %143 = arith.maximumf %141, %142 : vector<16x8xf32>
      %144 = arith.truncf %143 : vector<16x8xf32> to vector<16x8xbf16>
      %cst_113 = arith.constant dense<0.000000e+00> : vector<16x128xf32>
      %145 = tpu.matmul %144, %35, %cst_113 {dimension_numbers = #tpu.dot_dimension_numbers<[1], [0], [0], [1], [0, 0, 1, 1], [], []>} : vector<16x8xbf16>, vector<8x128xbf16>, vector<16x128xf32> -> vector<16x128xf32>
      %146 = vector.broadcast %33 : vector<1x128xf32> to vector<16x128xf32>
      %147 = arith.mulf %145, %146 : vector<16x128xf32>
      %148 = vector.broadcast %34 : vector<1x128xf32> to vector<16x128xf32>
      %149 = arith.addf %147, %148 : vector<16x128xf32>
      %cst_114 = arith.constant 0.000000e+00 : f32
      %150 = vector.broadcast %cst_114 : f32 to vector<16x128xf32>
      %151 = arith.maximumf %149, %150 : vector<16x128xf32>
      %152 = arith.truncf %151 : vector<16x128xf32> to vector<16x128xbf16>
      %153 = vector.shape_cast %152 : vector<16x128xbf16> to vector<2x8x128xbf16>
      %154 = vector.extract_strided_slice %153 {offsets = [0, 0, 0], sizes = [1, 8, 128], strides = [1, 1, 1]} : vector<2x8x128xbf16> to vector<1x8x128xbf16>
      %c0_115 = arith.constant 0 : index
      %c0_116 = arith.constant 0 : index
      %c0_117 = arith.constant 0 : index
      %155 = vector.load %arg15[%c0_115, %c0_116, %c0_117] : memref<5x8x128xbf16, #tpu.memory_space<vmem>>, vector<1x8x128xbf16>
      tpu.vector_store %arg15[%c0_115, %c0_116, %c0_117], %154 {strides = array<i32>} : memref<5x8x128xbf16, #tpu.memory_space<vmem>>, vector<1x8x128xbf16>,
      %156 = vector.extract_strided_slice %153 {offsets = [1, 0, 0], sizes = [1, 8, 128], strides = [1, 1, 1]} : vector<2x8x128xbf16> to vector<1x8x128xbf16>
      %c0_118 = arith.constant 0 : index
      %c1_119 = arith.constant 1 : index
      %c0_120 = arith.constant 0 : index
      %157 = vector.load %arg14[%c0_118, %c1_119, %c0_120] : memref<5x16x128xbf16, #tpu.memory_space<vmem>>, vector<1x8x128xbf16>
      tpu.vector_store %arg14[%c0_118, %c1_119, %c0_120], %156 {strides = array<i32>} : memref<5x16x128xbf16, #tpu.memory_space<vmem>>, vector<1x8x128xbf16>,
    } else {
    }
    %c0_56 = arith.constant 0 : index
    %c0_57 = arith.constant 0 : index
    %c0_58 = arith.constant 0 : index
    %83 = vector.load %arg14[%c0_56, %c0_57, %c0_58] : memref<5x16x128xbf16, #tpu.memory_space<vmem>>, vector<4x8x128xbf16>
    %c0_59 = arith.constant 0 : index
    %c0_60 = arith.constant 0 : index
    %c0_61 = arith.constant 0 : index
    %84 = vector.load %arg15[%c0_59, %c0_60, %c0_61] : memref<5x8x128xbf16, #tpu.memory_space<vmem>>, vector<4x8x128xbf16>
    %c0_62 = arith.constant 0 : index
    %c1_63 = arith.constant 1 : index
    %c0_64 = arith.constant 0 : index
    %85 = vector.load %arg14[%c0_62, %c1_63, %c0_64] : memref<5x16x128xbf16, #tpu.memory_space<vmem>>, vector<4x8x128xbf16>
    %c0_65 = arith.constant 0 : index
    %c0_66 = arith.constant 0 : index
    %c0_67 = arith.constant 0 : index
    %86 = vector.load %arg16[%c0_65, %c0_66, %c0_67] : memref<4x16x128xbf16, #tpu.memory_space<vmem>>, vector<4x8x128xbf16>
    %c0_68 = arith.constant 0 : index
    %c0_69 = arith.constant 0 : index
    %c0_70 = arith.constant 0 : index
    %87 = vector.load %arg17[%c0_68, %c0_69, %c0_70] : memref<4x8x128xbf16, #tpu.memory_space<vmem>>, vector<4x8x128xbf16>
    %c0_71 = arith.constant 0 : index
    %c1_72 = arith.constant 1 : index
    %c0_73 = arith.constant 0 : index
    %88 = vector.load %arg16[%c0_71, %c1_72, %c0_73] : memref<4x16x128xbf16, #tpu.memory_space<vmem>>, vector<4x8x128xbf16>
    %c1_74 = arith.constant 1 : index
    %c0_75 = arith.constant 0 : index
    %c0_76 = arith.constant 0 : index
    %89 = vector.load %arg14[%c1_74, %c0_75, %c0_76] : memref<5x16x128xbf16, #tpu.memory_space<vmem>>, vector<4x8x128xbf16>
    %c1_77 = arith.constant 1 : index
    %c0_78 = arith.constant 0 : index
    %c0_79 = arith.constant 0 : index
    %90 = vector.load %arg15[%c1_77, %c0_78, %c0_79] : memref<5x8x128xbf16, #tpu.memory_space<vmem>>, vector<4x8x128xbf16>
    %c1_80 = arith.constant 1 : index
    %c1_81 = arith.constant 1 : index
    %c0_82 = arith.constant 0 : index
    %91 = vector.load %arg14[%c1_80, %c1_81, %c0_82] : memref<5x16x128xbf16, #tpu.memory_space<vmem>>, vector<4x8x128xbf16>
    %cst_83 = arith.constant 0.000000e+00 : f32
    %92 = vector.broadcast %cst_83 : f32 to vector<32x128xf32>
    %93 = vector.shape_cast %83 : vector<4x8x128xbf16> to vector<32x128xbf16>
    %c0_84 = arith.constant 0 : index
    %c0_85 = arith.constant 0 : index
    %94 = vector.load %arg12[%c0_84, %c0_85] : memref<1152x128xbf16, #tpu.memory_space<vmem>>, vector<128x128xbf16>
    %cst_86 = arith.constant dense<0.000000e+00> : vector<32x128xf32>
    %95 = tpu.matmul %93, %94, %cst_86 {dimension_numbers = #tpu.dot_dimension_numbers<[1], [0], [0], [1], [0, 0, 1, 1], [], []>} : vector<32x128xbf16>, vector<128x128xbf16>, vector<32x128xf32> -> vector<32x128xf32>
    %96 = arith.addf %92, %95 : vector<32x128xf32>
    %97 = vector.shape_cast %84 : vector<4x8x128xbf16> to vector<32x128xbf16>
    %c128 = arith.constant 128 : index
    %c0_87 = arith.constant 0 : index
    %98 = vector.load %arg12[%c128, %c0_87] : memref<1152x128xbf16, #tpu.memory_space<vmem>>, vector<128x128xbf16>
    %cst_88 = arith.constant dense<0.000000e+00> : vector<32x128xf32>
    %99 = tpu.matmul %97, %98, %cst_88 {dimension_numbers = #tpu.dot_dimension_numbers<[1], [0], [0], [1], [0, 0, 1, 1], [], []>} : vector<32x128xbf16>, vector<128x128xbf16>, vector<32x128xf32> -> vector<32x128xf32>
    %100 = arith.addf %96, %99 : vector<32x128xf32>
    %101 = vector.shape_cast %85 : vector<4x8x128xbf16> to vector<32x128xbf16>
    %c256 = arith.constant 256 : index
    %c0_89 = arith.constant 0 : index
    %102 = vector.load %arg12[%c256, %c0_89] : memref<1152x128xbf16, #tpu.memory_space<vmem>>, vector<128x128xbf16>
    %cst_90 = arith.constant dense<0.000000e+00> : vector<32x128xf32>
    %103 = tpu.matmul %101, %102, %cst_90 {dimension_numbers = #tpu.dot_dimension_numbers<[1], [0], [0], [1], [0, 0, 1, 1], [], []>} : vector<32x128xbf16>, vector<128x128xbf16>, vector<32x128xf32> -> vector<32x128xf32>
    %104 = arith.addf %100, %103 : vector<32x128xf32>
    %105 = vector.shape_cast %86 : vector<4x8x128xbf16> to vector<32x128xbf16>
    %c384 = arith.constant 384 : index
    %c0_91 = arith.constant 0 : index
    %106 = vector.load %arg12[%c384, %c0_91] : memref<1152x128xbf16, #tpu.memory_space<vmem>>, vector<128x128xbf16>
    %cst_92 = arith.constant dense<0.000000e+00> : vector<32x128xf32>
    %107 = tpu.matmul %105, %106, %cst_92 {dimension_numbers = #tpu.dot_dimension_numbers<[1], [0], [0], [1], [0, 0, 1, 1], [], []>} : vector<32x128xbf16>, vector<128x128xbf16>, vector<32x128xf32> -> vector<32x128xf32>
    %108 = arith.addf %104, %107 : vector<32x128xf32>
    %109 = vector.shape_cast %87 : vector<4x8x128xbf16> to vector<32x128xbf16>
    %c512 = arith.constant 512 : index
    %c0_93 = arith.constant 0 : index
    %110 = vector.load %arg12[%c512, %c0_93] : memref<1152x128xbf16, #tpu.memory_space<vmem>>, vector<128x128xbf16>
    %cst_94 = arith.constant dense<0.000000e+00> : vector<32x128xf32>
    %111 = tpu.matmul %109, %110, %cst_94 {dimension_numbers = #tpu.dot_dimension_numbers<[1], [0], [0], [1], [0, 0, 1, 1], [], []>} : vector<32x128xbf16>, vector<128x128xbf16>, vector<32x128xf32> -> vector<32x128xf32>
    %112 = arith.addf %108, %111 : vector<32x128xf32>
    %113 = vector.shape_cast %88 : vector<4x8x128xbf16> to vector<32x128xbf16>
    %c640 = arith.constant 640 : index
    %c0_95 = arith.constant 0 : index
    %114 = vector.load %arg12[%c640, %c0_95] : memref<1152x128xbf16, #tpu.memory_space<vmem>>, vector<128x128xbf16>
    %cst_96 = arith.constant dense<0.000000e+00> : vector<32x128xf32>
    %115 = tpu.matmul %113, %114, %cst_96 {dimension_numbers = #tpu.dot_dimension_numbers<[1], [0], [0], [1], [0, 0, 1, 1], [], []>} : vector<32x128xbf16>, vector<128x128xbf16>, vector<32x128xf32> -> vector<32x128xf32>
    %116 = arith.addf %112, %115 : vector<32x128xf32>
    %117 = vector.shape_cast %89 : vector<4x8x128xbf16> to vector<32x128xbf16>
    %c768 = arith.constant 768 : index
    %c0_97 = arith.constant 0 : index
    %118 = vector.load %arg12[%c768, %c0_97] : memref<1152x128xbf16, #tpu.memory_space<vmem>>, vector<128x128xbf16>
    %cst_98 = arith.constant dense<0.000000e+00> : vector<32x128xf32>
    %119 = tpu.matmul %117, %118, %cst_98 {dimension_numbers = #tpu.dot_dimension_numbers<[1], [0], [0], [1], [0, 0, 1, 1], [], []>} : vector<32x128xbf16>, vector<128x128xbf16>, vector<32x128xf32> -> vector<32x128xf32>
    %120 = arith.addf %116, %119 : vector<32x128xf32>
    %121 = vector.shape_cast %90 : vector<4x8x128xbf16> to vector<32x128xbf16>
    %c896 = arith.constant 896 : index
    %c0_99 = arith.constant 0 : index
    %122 = vector.load %arg12[%c896, %c0_99] : memref<1152x128xbf16, #tpu.memory_space<vmem>>, vector<128x128xbf16>
    %cst_100 = arith.constant dense<0.000000e+00> : vector<32x128xf32>
    %123 = tpu.matmul %121, %122, %cst_100 {dimension_numbers = #tpu.dot_dimension_numbers<[1], [0], [0], [1], [0, 0, 1, 1], [], []>} : vector<32x128xbf16>, vector<128x128xbf16>, vector<32x128xf32> -> vector<32x128xf32>
    %124 = arith.addf %120, %123 : vector<32x128xf32>
    %125 = vector.shape_cast %91 : vector<4x8x128xbf16> to vector<32x128xbf16>
    %c1024 = arith.constant 1024 : index
    %c0_101 = arith.constant 0 : index
    %126 = vector.load %arg12[%c1024, %c0_101] : memref<1152x128xbf16, #tpu.memory_space<vmem>>, vector<128x128xbf16>
    %cst_102 = arith.constant dense<0.000000e+00> : vector<32x128xf32>
    %127 = tpu.matmul %125, %126, %cst_102 {dimension_numbers = #tpu.dot_dimension_numbers<[1], [0], [0], [1], [0, 0, 1, 1], [], []>} : vector<32x128xbf16>, vector<128x128xbf16>, vector<32x128xf32> -> vector<32x128xf32>
    %128 = arith.addf %124, %127 : vector<32x128xf32>
    %129 = vector.shape_cast %128 : vector<32x128xf32> to vector<4x8x128xf32>
    %130 = arith.truncf %129 : vector<4x8x128xf32> to vector<4x8x128xbf16>
    %c0_103 = arith.constant 0 : index
    %c0_104 = arith.constant 0 : index
    %c0_105 = arith.constant 0 : index
    %c128_106 = arith.constant 128 : index
    %131 = vector.load %arg13[%c0_103, %c0_104, %c0_105, %c128_106] : memref<1x4x8x256xbf16, #tpu.memory_space<vmem>>, vector<1x4x8x128xbf16>
    %132 = vector.shape_cast %131 : vector<1x4x8x128xbf16> to vector<4x8x128xbf16>
    %133 = vector.shape_cast %130 : vector<4x8x128xbf16> to vector<1x4x8x128xbf16>
    tpu.vector_store %arg13[%c0_103, %c0_104, %c0_105, %c128_106], %133 {strides = array<i32>} : memref<1x4x8x256xbf16, #tpu.memory_space<vmem>>, vector<1x4x8x128xbf16>,
    return
  }
  func.func @transform_0(%arg0: i32, %arg1: i32) -> (i32, i32, i32, i32, i32) {
    %c0_i32 = arith.constant 0 : i32
    %c0_i32_0 = arith.constant 0 : i32
    %c0_i32_1 = arith.constant 0 : i32
    %c0_i32_2 = arith.constant 0 : i32
    return %arg0, %c0_i32, %arg1, %c0_i32_0, %c0_i32_1 : i32, i32, i32, i32, i32
  }
  func.func @transform_1(%arg0: i32, %arg1: i32) -> (i32, i32, i32, i32, i32) {
    %c8_i32 = arith.constant 8 : i32
    %0 = arith.muli %c8_i32, %arg1 : i32
    %c1_i32 = arith.constant 1 : i32
    %1 = arith.subi %0, %c1_i32 : i32
    %c0_i32 = arith.constant 0 : i32
    %2 = arith.maxsi %1, %c0_i32 : i32
    %c0_i32_0 = arith.constant 0 : i32
    %c0_i32_1 = arith.constant 0 : i32
    %c0_i32_2 = arith.constant 0 : i32
    %c0_i32_3 = arith.constant 0 : i32
    return %arg0, %c0_i32_0, %2, %c0_i32_1, %c0_i32_2 : i32, i32, i32, i32, i32
  }
  func.func @transform_2(%arg0: i32, %arg1: i32) -> (i32, i32) {
    %c0_i32 = arith.constant 0 : i32
    %c0_i32_0 = arith.constant 0 : i32
    %c0_i32_1 = arith.constant 0 : i32
    return %c0_i32, %c0_i32_0 : i32, i32
  }
  func.func @transform_3(%arg0: i32, %arg1: i32) -> (i32, i32) {
    %c0_i32 = arith.constant 0 : i32
    %c0_i32_0 = arith.constant 0 : i32
    %c0_i32_1 = arith.constant 0 : i32
    return %c0_i32, %c0_i32_0 : i32, i32
  }
  func.func @transform_4(%arg0: i32, %arg1: i32) -> (i32, i32) {
    %c0_i32 = arith.constant 0 : i32
    %c0_i32_0 = arith.constant 0 : i32
    %c0_i32_1 = arith.constant 0 : i32
    return %c0_i32, %c0_i32_0 : i32, i32
  }
  func.func @transform_5(%arg0: i32, %arg1: i32) -> (i32, i32) {
    %c0_i32 = arith.constant 0 : i32
    %c0_i32_0 = arith.constant 0 : i32
    %c0_i32_1 = arith.constant 0 : i32
    return %c0_i32, %c0_i32_0 : i32, i32
  }
  func.func @transform_6(%arg0: i32, %arg1: i32) -> (i32, i32) {
    %c0_i32 = arith.constant 0 : i32
    %c0_i32_0 = arith.constant 0 : i32
    %c0_i32_1 = arith.constant 0 : i32
    return %c0_i32, %c0_i32_0 : i32, i32
  }
  func.func @transform_7(%arg0: i32, %arg1: i32) -> (i32, i32) {
    %c0_i32 = arith.constant 0 : i32
    %c0_i32_0 = arith.constant 0 : i32
    %c0_i32_1 = arith.constant 0 : i32
    return %c0_i32, %c0_i32_0 : i32, i32
  }
  func.func @transform_8(%arg0: i32, %arg1: i32) -> (i32, i32) {
    %c0_i32 = arith.constant 0 : i32
    %c0_i32_0 = arith.constant 0 : i32
    %c0_i32_1 = arith.constant 0 : i32
    return %c0_i32, %c0_i32_0 : i32, i32
  }
  func.func @transform_9(%arg0: i32, %arg1: i32) -> (i32, i32) {
    %c0_i32 = arith.constant 0 : i32
    %c0_i32_0 = arith.constant 0 : i32
    %c0_i32_1 = arith.constant 0 : i32
    return %c0_i32, %c0_i32_0 : i32, i32
  }
  func.func @transform_10(%arg0: i32, %arg1: i32) -> (i32, i32) {
    %c0_i32 = arith.constant 0 : i32
    %c0_i32_0 = arith.constant 0 : i32
    %c0_i32_1 = arith.constant 0 : i32
    return %c0_i32, %c0_i32_0 : i32, i32
  }
  func.func @transform_11(%arg0: i32, %arg1: i32) -> (i32, i32, i32, i32) {
    %c0_i32 = arith.constant 0 : i32
    %c0_i32_0 = arith.constant 0 : i32
    %c0_i32_1 = arith.constant 0 : i32
    return %arg0, %arg1, %c0_i32, %c0_i32_0 : i32, i32, i32, i32
  }
}

</mosaic_0001>

<bundles_post_ra>
// kernel: tpu_custom_call.1
= control target key start
LH: loop header
LB: loop body
LE: loop exit
PB: predicated region body
PF: predicated region fallthrough
CT: control target
= control target key end

     0   :  { %s4439_s0 = inlined_call_operand.vmem [shape: bf16[2,2,16,8,8], index: 0, kind: input, shape index: {}]   ;;  %s4440_s1 = inlined_call_operand.vmem [shape: bf16[2,2,16,8,8], index: 1, kind: input, shape index: {}]   ;;  %s4441_s2 = inlined_call_operand.vmem [shape: f32[1,8], index: 2, kind: input, shape index: {}]   ;;  %s4442_s3 = inlined_call_operand.vmem [shape: f32[1,8], index: 3, kind: input, shape index: {}]   ;;  %s4443_s4 = inlined_call_operand.vmem [shape: f32[1,8], index: 4, kind: input, shape index: {}]   ;;  %s4444_s5 = inlined_call_operand.vmem [shape: f32[1,8], index: 5, kind: input, shape index: {}]   ;;  %s4445_s6 = inlined_call_operand.vmem [shape: f32[1,128], index: 6, kind: input, shape index: {}]   ;;  %s4446_s7 = inlined_call_operand.vmem [shape: f32[1,128], index: 7, kind: input, shape index: {}]   ;;  %s4447_s8 = inlined_call_operand.vmem [shape: bf16[8,128], index: 8, kind: input, shape index: {}]   ;;  %s4448_s9 = inlined_call_operand.vmem [shape: bf16[8,128], index: 9, kind: input, shape index: {}]   ;;  %s4449_s10 = inlined_call_operand.vmem [shape: bf16[1152,128], index: 10, kind: input, shape index: {}]   ;;  %s4450_s11 = inlined_call_operand.hbm [shape: bf16[2,8,8,256], index: 11, kind: output, shape index: {}]  }
   0x1   :  { %4458 = sst [smem:[#allocation19_spill]] %s4449_s10 }
   0x2   :  { %4459 = sst [smem:[#allocation20_spill]] %s4450_s11 }
   0x3   :  { %16 = vsyncpa [#allocation9], 0 }
   0x4   :  { %18 = vsyncpa [#allocation9 + $0x1], 0  ;;  %s3753_s17 = smov 0   ;;  %s3755_s18 = smov 0  }
   0x5   :  { %s3757_s19 = smov 0   ;;  %s3759_s20 = smov 0  }
   0x6   :  { %s3761_s21 = smov 0   ;;  %s3763_s22 = smov 0  }
   0x7   :  { %s3765_s23 = smov 0   ;;  %s3767_s24 = smov 0  }
   0x8   :  { %s3769_s25 = smov 0   ;;  %s3771_s26 = smov 0  }
   0x9 LB: > { %4460 = sst [smem:[#allocation11_spill]] %s3649_s17  ;;  %s2806_s27 = sadd.s32 4294967295, %s3685_s26   ;;  %s3685_s26 = sphi %s3771_s26, %s24_s26   ;;  %s3681_s25 = sphi %s3769_s25, %s4500_s25   ;;  %s3677_s24 = sphi %s3767_s24, %s4499_s24   ;;  %s3673_s23 = sphi %s3765_s23, %s4498_s23   ;;  %s3669_s22 = sphi %s3763_s22, %s4497_s22   ;;  %s3665_s21 = sphi %s3761_s21, %s4496_s21   ;;  %s3661_s20 = sphi %s3759_s20, %s4495_s20   ;;  %s3657_s19 = sphi %s3757_s19, %s4494_s19   ;;  %s3653_s18 = sphi %s3755_s18, %s4493_s18   ;;  %s3649_s17 = sphi %s3753_s17, %s4492_s17  }
   0xa   : > { %4461 = sst [smem:[#allocation12_spill]] %s3669_s22  ;;  %s33_s29 = sadd.s32 1, %s3677_s24 }
   0xb   : > { %4462 = sst [smem:[#allocation13_spill]] %s3673_s23  ;;  %s36_s30 = sadd.s32 1, %s3681_s25 }
   0xc   : > { %p34_p0 = scmp.ge.s32.totalorder %s33_s29, 2  ;;  %s45_s12 = sadd.s32 1, %s3665_s21 }
   0xd   : > { %p52_p1 = scmp.ne.s32.totalorder %s3665_s21, %s3661_s20  ;;  %p53_p2 = scmp.eq.s32.totalorder %s3685_s26, 0 }
   0xe   : > { %s4502_s29 = smov (%p34_p0, %s33_s29), 0  ;;  %s4504_s30 = smov (!%p34_p0, %s36_s30), %s3681_s25 }
   0xf   : > { %4463 = sst [smem:[#allocation14_spill]] %s4502_s29  ;;  %s41_s13 = ssub.s32 %s3677_s24, %s4502_s29 }
  0x10   : > { %p3821_p3 = por %p53_p2, %p52_p1  ;;  %p38_p4 = scmp.ge.s32.totalorder %s4504_s30, 2 }
  0x11   : > { %s4453_s15 = sshll.u32 %s3677_s24, 3  ;;  %s2810_s28 = sshll.u32 %s4502_s29, 3 }
  0x12   : > { %s2809_s16 = sadd.s32 4294967295, %s4453_s15  ;;  %s4506_s30 = smov (%p38_p4, %s4504_s30), 0 }
  0x13   : > { %4465 = sst [smem:[#allocation15_spill]] %s4506_s30  ;;  %p70_p5 = scmp.gt.s32.totalorder %s2809_s16, 0 }
  0x14   : > { %s2811_s11 = sadd.s32 4294967295, %s2810_s28  ;;  %s40_s23 = ssub.s32 %s3681_s25, %s4506_s30 }
  0x15   : > { %p74_p6 = scmp.gt.s32.totalorder %s2811_s11, 0  ;;  %s42_s10 = sor.u32 %s41_s13, %s40_s23 }
  0x16   : > { %s81_s22 = sadd.s32 1, %s3657_s19  ;;  %p43_p7 = scmp.eq.s32.totalorder %s42_s10, 0 }
  0x17   : > { %p88_p8 = scmp.ne.s32.totalorder %s3657_s19, %s3653_s18  ;;  %s4508_s16 = smov (!%p70_p5, %s2809_s16), 0 }
  0x18   : > { %s3839_s15 = scalar_select %p43_p7, %s3665_s21, %s45_s12  }
  0x19   : > { %s4510_s11 = smov (!%p74_p6, %s2811_s11), 0  ;;  %p3843_p9 = por %p88_p8, %p53_p2 }
  0x1a   : > { %4466 = sst [smem:[#allocation16_spill]] %s3839_s15  ;;  %p309_p10 = scmp.eq.s32.totalorder %s2806_s27, 3 }
  0x1b   : > { %s77_s28 = ssub.s32 %s4508_s16, %s4510_s11  ;;  %p314_p11 = scmp.ne.s32.totalorder %s3661_s20, %s3649_s17 }
  0x1c   : > { %s78_s30 = sor.u32 %s77_s28, %s40_s23  ;;  %p3853_p12 = por %p309_p10, %p52_p1 }
  0x1d   : > { %p79_p13 = scmp.eq.s32.totalorder %s78_s30, 0  ;;  %s4469_s10 = sadd.s32 4294967294, %s3685_s26  }
  0x1e   : > { %p315_p0 = scmp.eq.s32.totalorder %s4469_s10, 3  ;;  %p2813_p2 = scmp.ge.s32.totalorder %s3685_s26, 4 }
  0x1f   : > { %s3860_s12 = scalar_select %p79_p13, %s3657_s19, %s81_s22  }
  0x20   : > { %p3862_p4 = por %p315_p0, %p314_p11  ;;  %358 = sbr.rel (%p2813_p2) target bundleno = 58 (0x3a), region = 52 }
  0x21   : > { %4470 = sst [smem:[#allocation17_spill]] %s3860_s12 }
  0x22   : > { %s4471_s15 = scalar_select %p3862_p4, 1, 0 }
  0x24   : > { %4472 = sst [smem:[#allocation18_spill]] %s4471_s15 }
  0x27   : > { %361 = sbr.rel (!%p3821_p3) target bundleno = 50 (0x32), region = 56  ;;  %s363_s11 = sand.u32 (%p3821_p3), 1, %s3665_s21  }
  0x28   : > { %s2816_s23 = sshll.u32 (%p3821_p3), %s3681_s25, 5  ;;  %s2814_s27 = sshll.u32 (%p3821_p3), %s363_s11, 6 }
  0x29   : > { %s4473_s30 = sshll.u32 (%p3821_p3), %s3677_s24, 3  ;;  %s365_s15 = scalar_lea.vmem (%p3821_p3), [#allocation6], %s2814_s27 }
  0x2a   : > { %s368_s28 = sadd.s32 (%p3821_p3), %s2816_s23, %s4473_s30 }
  0x2b   : > { %s2817_s22 = sshll.u32 (%p3821_p3), %s368_s28, 2 }
  0x2c   : > { %s370_s17 = scalar_lea.vmem (%p3821_p3), %s4439_s0, %s2817_s22 }
  0x2d   : > { %v386_v0 = vld [vmem:[%s370_s17] sm:$0xff] (%p3821_p3)   ;;  %v390_v1 = vld [vmem:[%s370_s17 + $0x8] sm:$0xff] (%p3821_p3)   ;;  %v394_v2 = vld [vmem:[%s370_s17 + $0x10] sm:$0xff] (%p3821_p3)  }
  0x2e   : > { %387 = vst [vmem:[%s365_s15] sm:$0xff] %v386_v0   ;;  %391 = vst [vmem:[%s365_s15 + $0x8] sm:$0xff] %v390_v1   ;;  %v398_v3 = vld [vmem:[%s370_s17 + $0x18] sm:$0xff]   ;;  %v402_v4 = vld [vmem:[%s370_s17 + $0x40] sm:$0xff]  }
  0x2f   : > { %395 = vst [vmem:[%s365_s15 + $0x10] sm:$0xff] %v394_v2   ;;  %v406_v5 = vld [vmem:[%s370_s17 + $0x48] sm:$0xff]   ;;  %399 = vst [vmem:[%s365_s15 + $0x18] sm:$0xff] %v398_v3   ;;  %v410_v6 = vld [vmem:[%s370_s17 + $0x50] sm:$0xff]  }
  0x30   : > { %403 = vst [vmem:[%s365_s15 + $0x20] sm:$0xff] %v402_v4   ;;  %407 = vst [vmem:[%s365_s15 + $0x28] sm:$0xff] %v406_v5   ;;  %v414_v7 = vld [vmem:[%s370_s17 + $0x58] sm:$0xff]  }
  0x31   : > { %411 = vst [vmem:[%s365_s15 + $0x30] sm:$0xff] %v410_v6   ;;  %415 = vst [vmem:[%s365_s15 + $0x38] sm:$0xff] %v414_v7  }
  0x32 PF: > { %472 = sbr.rel (!%p3843_p9) target bundleno = 58 (0x3a), region = 97  ;;  %s474_s14 = sand.u32 (%p3843_p9), 1, %s3657_s19  }
  0x33   : > { %s2821_s12 = sshll.u32 (%p3843_p9), %s3681_s25, 5  ;;  %s2818_s11 = sshll.u32 (%p3843_p9), %s474_s14, 3 }
  0x34   : > { %s482_s23 = sadd.s32 (%p3843_p9), %s2821_s12, %s4508_s16  ;;  %s476_s17 = scalar_lea.vmem (%p3843_p9), [#allocation7], %s2818_s11 }
  0x35   : > { %s2822_s27 = sshll.u32 (%p3843_p9), %s482_s23, 2 }
  0x36   : > { %s484_s22 = scalar_lea.vmem (%p3843_p9), %s4440_s1, %s2822_s27 }
  0x37   : > { %v500_v8 = vld [vmem:[%s484_s22] sm:$0xf] (%p3843_p9) }
  0x38   : > { %v502_v9 = vld [vmem:[%s484_s22 + $0x40] sm:$0xf] (%p3843_p9)  ;;  %501 = vst [vmem:[%s476_s17] sm:$0xf] (%p3843_p9), %v500_v8 }
  0x39   : > { %503 = vst [vmem:[%s476_s17 + $0x4] sm:$0xf] %v502_v9 }
  0x3a PF: > { %p2823_p1 = scmp.ge.s32.totalorder %s3685_s26, 1  ;;  %p529_p3 = scmp.lt.s32.totalorder %s3685_s26, 5 }
  0x3c   : > { %p530_p5 = pnand %p2823_p1, %p529_p3 }
  0x3d   : > { %vm661_vm0 = vcmask (!%p530_p5), 1043456   ;;  %v726_v10 = vld [vmem:[%s4448_s9] sm:$0xf] (!%p530_p5)  ;;  %s3890_s16 = sand.u32 (!%p530_p5), 1, %s3661_s20   ;;  %s543_s10 = sand.u32 (!%p530_p5), 1, %s3653_s18   ;;  %vm654_vm1 = vcmask (!%p530_p5), 64512  }
  0x3e   : > { %533 = sbr.rel (%p530_p5) target bundleno = 964 (0x3c4), region = 138  ;;  %3374 = vmatprep.subr.msk.bf16.mxu1 (!%p530_p5), %vm661_vm0, %v726_v10  ;;  %v3895_v11 = vsel (!%p530_p5), %vm661_vm0, %v726_v10, 0  ;;  %s2824_s14 = sshll.u32 (!%p530_p5), %s3890_s16, 6  ;;  %v3902_v12 = vld [vmem:[%s4443_s4] ss:$0 sm:$0xff] (!%p530_p5)  ;;  %vm1154_vm2 = vcmask (!%p530_p5), 1040384  }
  0x3f   : > { %3339 = vmatpush3.bf16.msra.mxu1 (!%p530_p5), %v3895_v11  ;;  %s3904_s23 = sshll.u32 (!%p530_p5), %s543_s10, 3  ;;  %v653_v13 = vld [vmem:[%s4447_s8] sm:$0xf] (!%p530_p5)  ;;  %s3909_s18 = scalar_lea.vmem (!%p530_p5), [#allocation6], %s2824_s14  ;;  %vm1155_vm3 = vsmask.f32 (!%p530_p5), 256 }
  0x40   : > { %v597_v14 = vld [vmem:[%s3909_s18 + $0x10] sm:$0xf] (!%p530_p5)  ;;  %v598_v15 = vld [vmem:[%s3909_s18 + $0x14] sm:$0xf] (!%p530_p5)  ;;  %3372 = vmatprep.subr.msk.bf16.mxu0 (!%p530_p5), %vm661_vm0, %v653_v13  ;;  %v599_v22 = vld [vmem:[%s3909_s18 + $0x18] sm:$0xf] (!%p530_p5) }
  0x41   : > { %v3914_v16 = vld [vmem:[%s3909_s18 + $0x30] sm:$0xf] (!%p530_p5)  ;;  %v3919_v17 = vld [vmem:[%s4444_s5] ss:$0 sm:$0xff] (!%p530_p5)  ;;  %v731_v20 = vunpack.c.l.bf16 (!%p530_p5), %v597_v14  ;;  %v732_v21 = vunpack.c.l.bf16 (!%p530_p5), %v598_v15  ;;  %v600_v26 = vld [vmem:[%s3909_s18 + $0x1c] sm:$0xf] (!%p530_p5)  ;;  %v733_v29 = vunpack.c.l.bf16 (!%p530_p5), %v599_v22 }
  0x42   : > { %v3923_v18 = vld [vmem:[%s3909_s18 + $0x34] sm:$0xf] (!%p530_p5)  ;;  %v613_v19 = vmax.bf16 (!%p530_p5), %v3914_v16, %v597_v14  ;;  %v739_v24 = vunpack.c.l.bf16 (!%p530_p5), %v3914_v16  ;;  %v3932_v27 = vld [vmem:[%s3909_s18 + $0x38] sm:$0xf] (!%p530_p5)  ;;  %v3935_v28 = vld [vmem:[%s3909_s18 + $0x3c] sm:$0xf] (!%p530_p5)  ;;  %v734_v38 = vunpack.c.l.bf16 (!%p530_p5), %v600_v26 }
  0x43   : > { %v614_v23 = vmax.bf16 (!%p530_p5), %v3923_v18, %v598_v15  ;;  %v740_v25 = vunpack.c.l.bf16 (!%p530_p5), %v3923_v18  ;;  %v753_v30 = vmul.f32 (!%p530_p5), %v3902_v12, %v731_v20  ;;  %v754_v31 = vmul.f32 (!%p530_p5), %v3902_v12, %v732_v21  ;;  %v3942_v34 = vld [vmem:[%s3909_s18] sm:$0xf] (!%p530_p5)  ;;  %v3945_v35 = vld [vmem:[%s3909_s18 + $0x4] sm:$0xf] (!%p530_p5)  ;;  %v595_v36 = vld [vmem:[%s3909_s18 + $0x8] sm:$0xf] (!%p530_p5) }
  0x44   : > { %v615_v32 = vmax.bf16 (!%p530_p5), %v3932_v27, %v599_v22  ;;  %v616_v33 = vmax.bf16 (!%p530_p5), %v3935_v28, %v600_v26  ;;  %v755_v39 = vmul.f32 (!%p530_p5), %v3902_v12, %v733_v29  ;;  %v663_v40 = vsel (!%p530_p5), %vm661_vm0, %v653_v13, 0  ;;  %v596_v41 = vld [vmem:[%s3909_s18 + $0xc] sm:$0xf] (!%p530_p5)  ;;  %v601_v42 = vld [vmem:[%s3909_s18 + $0x20] sm:$0xf] (!%p530_p5)  ;;  %vm4012_vm4 = vmand (!%p530_p5), %vm1154_vm2, %vm1155_vm3  ;;  %s2826_s30 = sshll.u32 (!%p530_p5), %s3890_s16, 5 }
  0x45   : > { %v619_v37 = vmax.bf16 %v614_v23, %v613_v19  ;;  %v775_v43 = vadd.f32 %v3919_v17, %v753_v30  ;;  %v776_v44 = vadd.f32 %v3919_v17, %v754_v31  ;;  %3129 = vmatpush3.bf16.msra.mxu0 %v663_v40  ;;  %v602_v45 = vld [vmem:[%s3909_s18 + $0x24] sm:$0xf]  ;;  %v603_v46 = vld [vmem:[%s3909_s18 + $0x28] sm:$0xf]  ;;  %v604_v47 = vld [vmem:[%s3909_s18 + $0x2c] sm:$0xf]  ;;  %v609_v48 = vmax.bf16 %v601_v42, %v3942_v34 }
  0x46   : > { %v727_v49 = vunpack.c.l.bf16 %v3942_v34  ;;  %v756_v51 = vmul.f32 %v3902_v12, %v734_v38  ;;  %v777_v52 = vadd.f32 %v3919_v17, %v755_v39  ;;  %v610_v53 = vmax.bf16 %v602_v45, %v3945_v35  ;;  %3373 = vmatprep.subr.msk.bf16.mxu0 %vm661_vm0, %v726_v10  ;;  %v2827_v0 = vld [vmem:[%s4441_s2] ss:$0 sm:$0xff]  ;;  %s4045_s18 = scalar_lea.vmem [#allocation8], %s2826_s30  ;;  %s545_s28 = scalar_lea.vmem [#allocation7], %s3904_s23 }
  0x47   : > { %v623_v50 = vunpack.c.l.bf16 %v619_v37  ;;  %v791_v54 = vmax.f32 %v775_v43, 0.0  ;;  %v792_v55 = vmax.f32 %v776_v44, 0.0  ;;  %v611_v56 = vmax.bf16 %v603_v46, %v595_v36  ;;  %v2828_v8 = vld [vmem:[%s4442_s3] ss:$0 sm:$0xff]  ;;  %s4478_s22 = sld [smem:[#allocation12_spill]] }
  0x48   : > { %v612_v57 = vmax.bf16 %v604_v47, %v596_v41  ;;  %v778_v58 = vadd.f32 %v3919_v17, %v756_v51  ;;  %v793_v59 = vmax.f32 %v777_v52, 0.0  ;;  %v617_v60 = vmax.bf16 %v610_v53, %v609_v48 }
  0x49   : > { %v728_v61 = vunpack.c.l.bf16 %v3945_v35  ;;  %v805_v62 = vpack.c.bf16 %v792_v55, %v791_v54  ;;  %v729_v1 = vunpack.c.l.bf16 %v595_v36  ;;  %v730_v2 = vunpack.c.l.bf16 %v596_v41 }
  0x4a   : > { %v618_v63 = vmax.bf16 %v612_v57, %v611_v56  ;;  %v794_v3 = vmax.f32 %v778_v58, 0.0  ;;  %v621_v4 = vunpack.c.l.bf16 %v617_v60  ;;  %v735_v5 = vunpack.c.l.bf16 %v601_v42 }
  0x4b   : > { %v736_v6 = vunpack.c.l.bf16 %v602_v45  ;;  %3140 = vmatprep.mubr.msk.bf16.mxu1 %vm654_vm1, %v805_v62  ;;  %v737_v9 = vunpack.c.l.bf16 %v603_v46  ;;  %v738_v10 = vunpack.c.l.bf16 %v604_v47  ;;  %v751_v13 = vmul.f32 %v3902_v12, %v729_v1 }
  0x4c   : > { %v622_v7 = vunpack.c.l.bf16 %v618_v63  ;;  %v806_v14 = vpack.c.bf16 %v794_v3, %v793_v59  ;;  %v632_v15 = vmul.f32 %v2827_v0, %v621_v4  ;;  %v752_v19 = vmul.f32 %v3902_v12, %v730_v2 }
  0x4d   : > { %v620_v20 = vmax.bf16 %v616_v33, %v615_v32  ;;  %v634_v22 = vmul.f32 %v2827_v0, %v623_v50  ;;  %v757_v23 = vmul.f32 %v3902_v12, %v735_v5  ;;  %v758_v26 = vmul.f32 %v3902_v12, %v736_v6  ;;  %p2859_p6 = scmp.le.s32.totalorder %s4478_s22, 0 }
  0x4e   : > { %v633_v21 = vmul.f32 %v2827_v0, %v622_v7  ;;  %3141 = vmatmul.mubr.msk.bf16.vlgmr.msra.gmra.mrb[0].mxu1 %vm654_vm1, %v806_v14  ;;  %v643_v29 = vadd.f32 %v2828_v8, %v632_v15  ;;  %v759_v31 = vmul.f32 %v3902_v12, %v737_v9  ;;  %v760_v34 = vmul.f32 %v3902_v12, %v738_v10 }
  0x4f   : > { %v624_v30 = vunpack.c.l.bf16 %v620_v20  ;;  %v645_v36 = vadd.f32 %v2828_v8, %v634_v22  ;;  %v779_v37 = vadd.f32 %v3919_v17, %v757_v23  ;;  %v780_v32 = vadd.f32 %v3919_v17, %v758_v26  ;;  %v4021_v20 = vld [vmem:[%s4445_s6] ss:$0 sm:$0xff] }
  0x50   : > { %v644_v35 = vadd.f32 %v2828_v8, %v633_v21  ;;  %v647_v33 = vmax.f32 %v643_v29, 0.0  ;;  %v781_v39 = vadd.f32 %v3919_v17, %v759_v31  ;;  %v782_v40 = vadd.f32 %v3919_v17, %v760_v34  ;;  %v4026_v21 = vld [vmem:[%s4446_s7] ss:$0 sm:$0xff] }
  0x51   : > { %v635_v38 = vmul.f32 %v2827_v0, %v624_v30  ;;  %v649_v42 = vmax.f32 %v645_v36, 0.0  ;;  %v795_v43 = vmax.f32 %v779_v37, 0.0  ;;  %v796_v44 = vmax.f32 %v780_v32, 0.0 }
  0x52   : > { %v648_v41 = vmax.f32 %v644_v35, 0.0  ;;  %v797_v46 = vmax.f32 %v781_v39, 0.0  ;;  %v798_v47 = vmax.f32 %v782_v40, 0.0  ;;  %v749_v48 = vmul.f32 %v3902_v12, %v727_v49 }
  0x53   : > { %v646_v45 = vadd.f32 %v2828_v8, %v635_v38  ;;  %v807_v51 = vpack.c.bf16 %v796_v44, %v795_v43  ;;  %v750_v52 = vmul.f32 %v3902_v12, %v728_v61  ;;  %v773_v53 = vadd.f32 %v3919_v17, %v751_v13 }
  0x54   : > { %v651_v50 = vpack.c.bf16 %v648_v41, %v647_v33  ;;  %v808_v55 = vpack.c.bf16 %v798_v47, %v797_v46  ;;  %v771_v56 = vadd.f32 %v3919_v17, %v749_v48  ;;  %v774_v57 = vadd.f32 %v3919_v17, %v752_v19 }
  0x55   : > { %v650_v54 = vmax.f32 %v646_v45, 0.0  ;;  %3144 = vmatprep.mubr.msk.bf16.mxu1 %vm654_vm1, %v807_v51  ;;  %v772_v58 = vadd.f32 %v3919_v17, %v750_v52  ;;  %v761_v49 = vmul.f32 %v3902_v12, %v739_v24  ;;  %v762_v59 = vmul.f32 %v3902_v12, %v740_v25 }
  0x56   : > { %3130 = vmatprep.mubr.msk.bf16.mxu0 %vm654_vm1, %v651_v50  ;;  %3145 = vmatmul.mubr.msk.bf16.gmra.mrb[4].mxu1 %vm654_vm1, %v808_v55  ;;  %v787_v61 = vmax.f32 %v771_v56, 0.0  ;;  %v741_v62 = vunpack.c.l.bf16 %v3932_v27  ;;  %v742_v2 = vunpack.c.l.bf16 %v3935_v28  ;;  %v789_v16 = vmax.f32 %v773_v53, 0.0 }
  0x57   : > { %v652_v60 = vpack.c.bf16 %v650_v54, %v649_v42  ;;  %v788_v63 = vmax.f32 %v772_v58, 0.0  ;;  %v783_v0 = vadd.f32 %v3919_v17, %v761_v49  ;;  %v784_v1 = vadd.f32 %v3919_v17, %v762_v59 }
  0x58   : > { %v790_v24 = vmax.f32 %v774_v57, 0.0  ;;  %v763_v18 = vmul.f32 %v3902_v12, %v741_v62  ;;  %v764_v27 = vmul.f32 %v3902_v12, %v742_v2  ;;  %v3687_v13 = vmov 0  }
  0x59   : > { %3131 = vmatmul.mubr.msk.bf16.vlgmr.msra.gmra.mrb[0].mxu0 %vm654_vm1, %v652_v60  ;;  %v803_v25 = vpack.c.bf16 %v788_v63, %v787_v61  ;;  %v799_v3 = vmax.f32 %v783_v0, 0.0  ;;  %v800_v4 = vmax.f32 %v784_v1, 0.0  ;;  %1152 = vst [vmem:[#allocation2] sm:$0xff] %v3687_v13  ;;  %1153 = vst [vmem:[#allocation3] sm:$0xf] %v3687_v13  ;;  %vm1088_vm5 = vcmask 1044480  }
  0x5a   : > { %3135 = vmatpush3.bf16.msra.mxu0 %v3895_v11  ;;  %v785_v5 = vadd.f32 %v3919_v17, %v763_v18  ;;  %v786_v28 = vadd.f32 %v3919_v17, %v764_v27  ;;  %v804_v7 = vpack.c.bf16 %v790_v24, %v789_v16  ;;  %vm1089_vm6 = vsmask.f32 4354  ;;  %v1094_v27 = vld [vmem:[#allocation4 + $0x8] sm:$0x1f] }
  0x5b   : > { %3136 = vmatprep.mubr.msk.bf16.mxu0 %vm654_vm1, %v803_v25  ;;  %v809_v6 = vpack.c.bf16 %v800_v4, %v799_v3  ;;  %vm4056_vm7 = vmand %vm1088_vm5, %vm1089_vm6  ;;  %vm3689_vm8 = vmmov (!%p2859_p6), 0  }
  0x5c   : > { %v801_v8 = vmax.f32 %v785_v5, 0.0  ;;  %v802_v9 = vmax.f32 %v786_v28, 0.0 }
  0x5d   : > { %3148 = vmatprep.mubr.msk.bf16.mxu1 %vm654_vm1, %v809_v6 }
  0x5e   : > { %v810_v10 = vpack.c.bf16 %v802_v9, %v801_v8 }
  0x60   : > { %3149 = vmatmul.mubr.msk.bf16.gmra.mrb[8].mxu1 %vm654_vm1, %v810_v10  ;;  %v1157_v15 = vld [vmem:[#allocation2] sm:$0x1] }
  0x61   : > { %3137 = vmatmul.mubr.msk.bf16.vlgmr.msra.gmra.mrb[4].mxu0 %vm654_vm1, %v804_v7  ;;  %v1158_v19 = vsel %vm4012_vm4, 0, %v1157_v15 }
  0x62   : > { %1159 = vst [vmem:[#allocation2] sm:$0x1] %v1158_v19 }
 0x121   : > { %v3142_v22 = vpop.f32.mrb[0].mxu1 }
 0x122   : > { %v947_v23 = vmul.f32 %v3142_v22, %v4021_v20  ;;  %v888_v26 = vpop.f32.mrb[1].mxu1 }
 0x123   : > { %v945_v29 = vmul.f32 %v4021_v20, %v888_v26  ;;  %v3143_v30 = vpop.f32.mrb[2].mxu1 }
 0x124   : > { %v969_v31 = vadd.f32 %v4026_v21, %v947_v23  ;;  %v948_v34 = vmul.f32 %v3143_v30, %v4021_v20  ;;  %v891_v35 = vpop.f32.mrb[3].mxu1 }
 0x125   : > { %v967_v36 = vadd.f32 %v4026_v21, %v945_v29  ;;  %v946_v42 = vmul.f32 %v4021_v20, %v891_v35 }
 0x126   : > { %v985_v37 = vmax.f32 %v969_v31, 0.0  ;;  %v970_v32 = vadd.f32 %v4026_v21, %v948_v34 }
 0x127   : > { %v983_v33 = vmax.f32 %v967_v36, 0.0  ;;  %v4043_v58 = vadd.f32 %v4026_v21, %v946_v42  ;;  %v1091_v36 = vld [vmem:[#allocation4] sm:$0x1f] }
 0x128   : > { %v986_v38 = vmax.f32 %v970_v32, 0.0 }
 0x129   : > { %v3011_v39 = vpack.c.bf16 %v985_v37, %v983_v33  ;;  %v3146_v40 = vpop.f32.mrb[4].mxu1  ;;  %v984_v18 = vmax.f32 %v4043_v58, 0.0 }
 0x12a   : > { %v2991_v41 = vpack.c.bf16 %v986_v38, %v986_v38  ;;  %v951_v43 = vmul.f32 %v3146_v40, %v4021_v20  ;;  %v904_v44 = vpop.f32.mrb[5].mxu1 }
 0x12b   : > { %3022 = vst [vmem:[#allocation5 + $0x8] sm:$0xff] %v3011_v39   ;;  %v949_v46 = vmul.f32 %v4021_v20, %v904_v44  ;;  %v3147_v47 = vpop.f32.mrb[6].mxu1 }
 0x12c   : > { %v3132_v45 = vpop.f32.mrb[0].mxu0  ;;  %1051 = vst [vmem:[#allocation3 + $0x10] sm:$0xf] %v2991_v41  ;;  %v973_v50 = vadd.f32 %v4026_v21, %v951_v43  ;;  %v952_v52 = vmul.f32 %v3147_v47, %v4021_v20  ;;  %v907_v53 = vpop.f32.mrb[7].mxu1  ;;  %v1143_v41 = vld [vmem:[#allocation2 + $0x10] sm:$0x1f] }
 0x12d   : > { %v716_v48 = vpack.c.bf16 %v3132_v45, %v3132_v45  ;;  %v699_v51 = vpop.f32.mrb[1].mxu0  ;;  %v971_v55 = vadd.f32 %v4026_v21, %v949_v46  ;;  %v950_v57 = vmul.f32 %v4021_v20, %v907_v53 }
 0x12e   : > { %v714_v54 = vpack.c.bf16 %v699_v51, %v699_v51  ;;  %v3133_v56 = vpop.f32.mrb[2].mxu0  ;;  %v989_v49 = vmax.f32 %v973_v50, 0.0  ;;  %v974_v60 = vadd.f32 %v4026_v21, %v952_v52 }
 0x12f   : > { %720 = vst [vmem:[%s4045_s18 + $0x10] sm:$0xf] %v716_v48  ;;  %v717_v59 = vpack.c.bf16 %v3133_v56, %v3133_v56  ;;  %v702_v61 = vpop.f32.mrb[3].mxu0  ;;  %v987_v62 = vmax.f32 %v971_v55, 0.0  ;;  %v972_v0 = vadd.f32 %v4026_v21, %v950_v57  ;;  %v1140_v48 = vld [vmem:[#allocation2 + $0x8] sm:$0x1f] }
 0x130   : > { %718 = vst [vmem:[%s4045_s18] sm:$0xf] %v714_v54  ;;  %v715_v63 = vpack.c.bf16 %v702_v61, %v702_v61  ;;  %v2993_v1 = vpack.c.bf16 %v989_v49, %v989_v49  ;;  %v990_v2 = vmax.f32 %v974_v60, 0.0 }
 0x131   : > { %721 = vst [vmem:[%s4045_s18 + $0x18] sm:$0xf] %v717_v59  ;;  %v2992_v16 = vpack.c.bf16 %v987_v62, %v987_v62  ;;  %v988_v24 = vmax.f32 %v972_v0, 0.0 }
 0x132   : > { %719 = vst [vmem:[%s4045_s18 + $0x8] sm:$0xf] %v715_v63  ;;  %v1064_v25 = vshrl.u32 %v2993_v1, 16  ;;  %v2997_v3 = vpack.c.bf16 %v990_v2, %v990_v2  ;;  %v1067_v4 = vshll.u32 %v2993_v1, 16 }
 0x133   : > { %v1057_v5 = vshrl.u32 %v2992_v16, 16  ;;  %v1060_v6 = vshll.u32 %v2992_v16, 16  ;;  %v2996_v28 = vpack.c.bf16 %v988_v24, %v988_v24  ;;  %v3150_v19 = vpop.f32.mrb[8].mxu1 }
 0x134   : > { %v3138_v7 = vpop.f32.mrb[4].mxu0  ;;  %v1066_v8 = vrot.slane %v1064_v25, 7  ;;  %v1115_v9 = vshrl.u32 %v2997_v3, 16  ;;  %v1118_v10 = vshll.u32 %v2997_v3, 16  ;;  %v920_v34 = vpop.f32.mrb[9].mxu1  ;;  %v955_v44 = vmul.f32 %v3150_v19, %v4021_v20 }
 0x135   : > { %v943_v13 = vmul.f32 %v3138_v7, %v4021_v20  ;;  %v872_v15 = vpop.f32.mrb[5].mxu0  ;;  %v1059_v23 = vrot.slane %v1057_v5, 7  ;;  %v1108_v26 = vshrl.u32 %v2996_v28, 16  ;;  %v1111_v29 = vshll.u32 %v2996_v28, 16  ;;  %v3151_v38 = vpop.f32.mrb[10].mxu1 }
 0x136   : > { %v941_v30 = vmul.f32 %v4021_v20, %v872_v15  ;;  %v3139_v31 = vpop.f32.mrb[6].mxu0  ;;  %v1069_v35 = vor.u32 %v1067_v4, %v1066_v8  ;;  %v1117_v37 = vrot.slane %v1115_v9, 7  ;;  %v923_v45 = vpop.f32.mrb[11].mxu1  ;;  %v977_v55 = vadd.f32 %v4026_v21, %v955_v44 }
 0x137   : > { %v965_v32 = vadd.f32 %v4026_v21, %v943_v13  ;;  %v944_v33 = vmul.f32 %v3139_v31, %v4021_v20  ;;  %v875_v39 = vpop.f32.mrb[7].mxu0  ;;  %v1062_v40 = vor.u32 %v1060_v6, %v1059_v23  ;;  %v1110_v42 = vrot.slane %v1108_v26, 7 }
 0x138   : > { %v963_v43 = vadd.f32 %v4026_v21, %v941_v30  ;;  %v1095_v46 = vsel %vm4056_vm7, %v1069_v35, %v1094_v27  ;;  %v1120_v47 = vor.u32 %v1118_v10, %v1117_v37  ;;  %v953_v58 = vmul.f32 %v4021_v20, %v920_v34 }
 0x139   : > { %v981_v50 = vmax.f32 %v965_v32, 0.0  ;;  %v966_v51 = vadd.f32 %v4026_v21, %v944_v33  ;;  %1096 = vst [vmem:[#allocation4 + $0x8] sm:$0x1f] %v1095_v46  ;;  %v1092_v52 = vsel %vm4056_vm7, %v1062_v40, %v1091_v36  ;;  %v1113_v53 = vor.u32 %v1111_v29, %v1110_v42  ;;  %v1149_v42 = vld [vmem:[#allocation2 + $0x20] sm:$0x1f] }
 0x13a   : > { %v979_v54 = vmax.f32 %v963_v43, 0.0  ;;  %1093 = vst [vmem:[#allocation4] sm:$0x1f] %v1092_v52  ;;  %v1144_v56 = vsel %vm4056_vm7, %v1120_v47, %v1143_v41  ;;  %v956_v49 = vmul.f32 %v3151_v38, %v4021_v20  ;;  %v993_v61 = vmax.f32 %v977_v55, 0.0  ;;  %v1097_v41 = vld [vmem:[#allocation4 + $0x10] sm:$0x1f] }
 0x13b   : > { %v982_v57 = vmax.f32 %v966_v51, 0.0  ;;  %1145 = vst [vmem:[#allocation2 + $0x10] sm:$0x1f] %v1144_v56  ;;  %v1141_v59 = vsel %vm4056_vm7, %v1113_v53, %v1140_v48  ;;  %v954_v62 = vmul.f32 %v4021_v20, %v923_v45  ;;  %v975_v0 = vadd.f32 %v4026_v21, %v953_v58  ;;  %v1146_v48 = vld [vmem:[#allocation2 + $0x18] sm:$0x1f] }
 0x13c   : > { %v3006_v60 = vpack.c.bf16 %v981_v50, %v979_v54  ;;  %1142 = vst [vmem:[#allocation2 + $0x8] sm:$0x1f] %v1141_v59  ;;  %v978_v1 = vadd.f32 %v4026_v21, %v956_v49  ;;  %v942_v2 = vmul.f32 %v4021_v20, %v875_v39  ;;  %v2995_v16 = vpack.c.bf16 %v993_v61, %v993_v61  ;;  %v3019_v61 = vld [vmem:[%s545_s28] sm:$0xff] (!%p2859_p6)  }
 0x13d   : > { %v3016_v63 = vpack.c.bf16 %v984_v18, %v982_v57  ;;  %v976_v24 = vadd.f32 %v4026_v21, %v954_v62  ;;  %v991_v25 = vmax.f32 %v975_v0, 0.0  ;;  %v1100_v18 = vld [vmem:[#allocation4 + $0x18] sm:$0x1f]  ;;  %v3688_v62 = vmov (!%p2859_p6), 0.0  }
 0x13e   : > { %3007 = vst [vmem:[#allocation5] sm:$0xff] %v3006_v60   ;;  %v994_v3 = vmax.f32 %v978_v1, 0.0  ;;  %v964_v4 = vadd.f32 %v4026_v21, %v942_v2  ;;  %v1078_v27 = vshrl.u32 %v2995_v16, 16  ;;  %v1081_v28 = vshll.u32 %v2995_v16, 16  ;;  %3152 = vmatprep.subr.bf16.mxu0 (!%p2859_p6), %v3688_v62  ;;  %3154 = vmatprep.mubr.msk.bf16.mxu0 (!%p2859_p6), %vm3689_vm8, %v3688_v62 }
 0x13f   : > { %3023 = vst [vmem:[#allocation3 + $0x8] sm:$0xff] %v3016_v63   ;;  %v992_v5 = vmax.f32 %v976_v24, 0.0  ;;  %v2994_v7 = vpack.c.bf16 %v991_v25, %v991_v25  ;;  %v3020_v63 = vunpack.c.l.bf16 (!%p2859_p6), %v3019_v61  ;;  %v3021_v0 = vunpack.c.h.bf16 (!%p2859_p6), %v3019_v61  ;;  %3153 = vmatpush3.bf16.msra.mxu0 (!%p2859_p6), %v3895_v11 }
 0x140   : > { %v1175_v6 = vld [vmem:[#allocation4 + $0x8] sm:$0x1]  ;;  %v2999_v8 = vpack.c.bf16 %v994_v3, %v994_v3  ;;  %v1080_v13 = vrot.slane %v1078_v27, 7  ;;  %v980_v19 = vmax.f32 %v964_v4, 0.0 }
 0x141   : > { %v1176_v9 = vsel %vm4012_vm4, 0, %v1175_v6  ;;  %v1172_v10 = vld [vmem:[#allocation4] sm:$0x1]  ;;  %v2998_v15 = vpack.c.bf16 %v992_v5, %v992_v5  ;;  %v1071_v29 = vshrl.u32 %v2994_v7, 16  ;;  %v1074_v36 = vshll.u32 %v2994_v7, 16 }
 0x142   : > { %1177 = vst [vmem:[#allocation4 + $0x8] sm:$0x1] %v1176_v9  ;;  %v1173_v23 = vsel %vm4012_vm4, 0, %v1172_v10  ;;  %v1163_v26 = vld [vmem:[#allocation2 + $0x10] sm:$0x1]  ;;  %v1129_v30 = vshrl.u32 %v2999_v8, 16  ;;  %v1083_v35 = vor.u32 %v1081_v28, %v1080_v13  ;;  %v2985_v45 = vpack.c.bf16 %v980_v19, %v980_v19 }
 0x143   : > { %1174 = vst [vmem:[#allocation4] sm:$0x1] %v1173_v23  ;;  %v1164_v31 = vsel %vm4012_vm4, 0, %v1163_v26  ;;  %v1160_v34 = vld [vmem:[#allocation2 + $0x8] sm:$0x1]  ;;  %v1122_v37 = vshrl.u32 %v2998_v15, 16  ;;  %v1192_v1 = vmul.f32 (!%p2859_p6), %v3020_v63, %v3902_v12  ;;  %v1193_v2 = vmul.f32 (!%p2859_p6), %v3021_v0, %v3902_v12 }
 0x144   : > { %1165 = vst [vmem:[#allocation2 + $0x10] sm:$0x1] %v1164_v31  ;;  %v1161_v32 = vsel %vm4012_vm4, 0, %v1160_v34  ;;  %v1073_v33 = vrot.slane %v1071_v29, 7  ;;  %v1131_v38 = vrot.slane %v1129_v30, 7  ;;  %v1132_v39 = vshll.u32 %v2999_v8, 16 }
 0x145   : > { %1162 = vst [vmem:[#allocation2 + $0x8] sm:$0x1] %v1161_v32  ;;  %v1101_v40 = vsel %vm4056_vm7, %v1083_v35, %v1100_v18  ;;  %v1124_v43 = vrot.slane %v1122_v37, 7  ;;  %v1125_v44 = vshll.u32 %v2998_v15, 16  ;;  %1048 = vst [vmem:[#allocation3 + $0x4] sm:$0xf] %v2985_v45  ;;  %v1194_v14 = vadd.f32 (!%p2859_p6), %v3919_v17, %v1192_v1 }
 0x146   : > { %1102 = vst [vmem:[#allocation4 + $0x18] sm:$0x1f] %v1101_v40  ;;  %v1076_v46 = vor.u32 %v1074_v36, %v1073_v33  ;;  %v1134_v47 = vor.u32 %v1132_v39, %v1131_v38  ;;  %v1195_v16 = vadd.f32 (!%p2859_p6), %v3919_v17, %v1193_v2  ;;  %v1265_v19 = vld [vmem:[#allocation2] sm:$0x1f] (!%p2859_p6) }
 0x147   : > { %v1127_v50 = vor.u32 %v1125_v44, %v1124_v43  ;;  %v1196_v24 = vmax.f32 (!%p2859_p6), %v1194_v14, 0.0 }
 0x148   : > { %v1098_v51 = vsel %vm4056_vm7, %v1076_v46, %v1097_v41  ;;  %v1150_v52 = vsel %vm4056_vm7, %v1134_v47, %v1149_v42  ;;  %v1197_v25 = vmax.f32 (!%p2859_p6), %v1195_v16, 0.0 }
 0x149   : > { %1099 = vst [vmem:[#allocation4 + $0x10] sm:$0x1f] %v1098_v51  ;;  %1151 = vst [vmem:[#allocation2 + $0x20] sm:$0x1f] %v1150_v52  ;;  %v1147_v53 = vsel %vm4056_vm7, %v1127_v50, %v1146_v48 }
 0x14a   : > { %1148 = vst [vmem:[#allocation2 + $0x18] sm:$0x1f] %v1147_v53  ;;  %v1198_v3 = vpack.c.bf16 (!%p2859_p6), %v1197_v25, %v1196_v24 }
 0x14c   : > { %3155 = vmatmul.mubr.msk.bf16.vlgmr.msra.gmra.mrb[0].mxu0 (!%p2859_p6), %vm654_vm1, %v1198_v3 }
 0x14d   : > { %v1181_v54 = vld [vmem:[#allocation4 + $0x18] sm:$0x1]  ;;  %1187 = sbr.rel (%p2859_p6) target bundleno = 562 (0x232), region = 150 }
 0x14e   : > { %v1182_v55 = vsel %vm4012_vm4, 0, %v1181_v54 }
 0x14f   : > { %1183 = vst [vmem:[#allocation4 + $0x18] sm:$0x1] %v1182_v55 }
 0x150   : > { %v1178_v56 = vld [vmem:[#allocation4 + $0x10] sm:$0x1]  ;;  %v1169_v57 = vld [vmem:[#allocation2 + $0x20] sm:$0x1] }
 0x151   : > { %v1179_v58 = vsel %vm4012_vm4, 0, %v1178_v56  ;;  %v1170_v49 = vsel %vm4012_vm4, 0, %v1169_v57  ;;  %v1166_v59 = vld [vmem:[#allocation2 + $0x18] sm:$0x1] }
 0x152   : > { %1180 = vst [vmem:[#allocation4 + $0x10] sm:$0x1] %v1179_v58  ;;  %1171 = vst [vmem:[#allocation2 + $0x20] sm:$0x1] %v1170_v49  ;;  %v1167_v60 = vsel %vm4012_vm4, 0, %v1166_v59 }
 0x153   : > { %1168 = vst [vmem:[#allocation2 + $0x18] sm:$0x1] %v1167_v60 }
 0x21f   : > { %v1236_v4 = vpop.f32.mrb[0].mxu0 }
 0x220   : > { %v1243_v27 = vmul.f32 %v4021_v20, %v1236_v4  ;;  %v3156_v5 = vpop.f32.mrb[1].mxu0 }
 0x221   : > { %v1239_v6 = vpop.f32.mrb[2].mxu0 }
 0x222   : > { %v1245_v11 = vadd.f32 %v4026_v21, %v1243_v27  ;;  %v1244_v28 = vmul.f32 %v4021_v20, %v1239_v6  ;;  %v3157_v18 = vpop.f32.mrb[3].mxu0 }
 0x224   : > { %v1247_v12 = vmax.f32 %v1245_v11, 0.0  ;;  %v1246_v7 = vadd.f32 %v4026_v21, %v1244_v28 }
 0x226   : > { %v3000_v8 = vpack.c.bf16 %v1247_v12, %v1247_v12  ;;  %v1248_v17 = vmax.f32 %v1246_v7, 0.0 }
 0x228   : > { %1255 = vst [vmem:[#allocation3] sm:$0xf] %v3000_v8  ;;  %v3001_v9 = vpack.c.bf16 %v1248_v17, %v1248_v17 }
 0x22a   : > { %v1258_v10 = vshrl.u32 %v3001_v9, 16  ;;  %v1261_v15 = vshll.u32 %v3001_v9, 16 }
 0x22c   : > { %v1260_v13 = vrot.slane %v1258_v10, 7 }
 0x22e   : > { %v1263_v23 = vor.u32 %v1261_v15, %v1260_v13 }
 0x230   : > { %v1266_v26 = vsel %vm4056_vm7, %v1263_v23, %v1265_v19 }
 0x231   : > { %1267 = vst [vmem:[#allocation2] sm:$0x1f] %v1266_v26 }
 0x232 PF: > { %s4479_s29 = sld [smem:[#allocation19_spill]]  ;;  %v3483_v33 = vld [vmem:[#allocation3] sm:$0xff]   ;;  %v3485_v39 = vld [vmem:[#allocation5] sm:$0xff]   ;;  %v3487_v46 = vld [vmem:[#allocation3 + $0x8] sm:$0xff]   ;;  %vm1574_vm9 = vsmask.f32 3328 }
 0x233   : > { %3174 = vmatprep.mubr.bf16.mxu1 %v3483_v33  ;;  %3254 = vmatprep.mubr.bf16.mxu0 %v3485_v39  ;;  %v3488_v47 = vld [vmem:[#allocation5 + $0x8] sm:$0xff]   ;;  %v1288_v54 = vld [vmem:[#allocation4] sm:$0x1f]  ;;  %vm1575_vm10 = vsmask.f32 7440  ;;  %s4482_s22 = sld [smem:[#allocation12_spill]] }
 0x234   : > { %v1289_v55 = vld [vmem:[#allocation4 + $0x8] sm:$0x1f]  ;;  %v2921_v56 = vcombine.low %v1288_v54, %v1288_v54  ;;  %v2922_v57 = vcombine.high %v1288_v54, %v1288_v54  ;;  %v1291_v3 = vld [vmem:[#allocation4 + $0x18] sm:$0x1f]  ;;  %vm4201_vm11 = vmor %vm1574_vm9, %vm1575_vm10  ;;  %s4483_s23 = sld [smem:[#allocation13_spill]]  ;;  %s2701_s27 = sshll.u32 %s4045_s18, 4  ;;  %s4376_s27 = int_to_ptr.vmem [resolvable:$true] %s2701_s27 }
 0x235   : > { %v2923_v58 = vcombine.low %v1289_v55, %v1289_v55  ;;  %v2924_v60 = vcombine.high %v1289_v55, %v1289_v55  ;;  %v2927_v12 = vcombine.low %v1291_v3, %v1291_v3  ;;  %v2928_v7 = vcombine.high %v1291_v3, %v1291_v3  ;;  %v1278_v3 = vld [vmem:[#allocation2 + $0x10] sm:$0x1f]  ;;  %s2685_s17 = scalar_lea.sflag [#allocation9], %s3890_s16 }
 0x236   : > { %v2037_v61 = vshrl.u32 %v2921_v56, 16  ;;  %v2040_v62 = vshll.u32 %v2921_v56, 16  ;;  %v2046_v63 = vshll.u32 %v2922_v57, 16 }
 0x237   : > { %v2051_v0 = vshrl.u32 %v2923_v58, 16  ;;  %v2054_v1 = vshll.u32 %v2923_v58, 16  ;;  %v2060_v2 = vshll.u32 %v2924_v60, 16  ;;  %v1290_v14 = vld [vmem:[#allocation4 + $0x10] sm:$0x1f]  ;;  %v2079_v19 = vshrl.u32 %v2927_v12, 16 }
 0x238   : > { %v3467_v20 = vld [vmem:[%s4479_s29 + $0x40] sm:$0xff]   ;;  %v3469_v29 = vld [vmem:[%s4479_s29 + $0x48] sm:$0xff]   ;;  %v3471_v30 = vld [vmem:[%s4479_s29 + $0x50] sm:$0xff]   ;;  %v2039_v16 = vrot.slane %v2037_v61, 4  ;;  %v2042_v24 = vrot.slane %v2040_v62, 5  ;;  %v2925_v5 = vcombine.low %v1290_v14, %v1290_v14  ;;  %v2926_v6 = vcombine.high %v1290_v14, %v1290_v14 }
 0x239   : > { %v3468_v21 = vld [vmem:[%s4479_s29 + $0x100] sm:$0xff]   ;;  %3158 = vmatprep.subr.bf16.mxu1 %v3467_v20  ;;  %v3470_v22 = vld [vmem:[%s4479_s29 + $0x108] sm:$0xff]   ;;  %v3472_v31 = vld [vmem:[%s4479_s29 + $0x110] sm:$0xff]   ;;  %v2053_v25 = vrot.slane %v2051_v0, 4  ;;  %v2056_v27 = vrot.slane %v2054_v1, 5  ;;  %v2048_v18 = vrot.slane %v2046_v63, 5 }
 0x23a   : > { %3238 = vmatprep.subr.bf16.mxu0 %v3468_v21  ;;  %3159 = vmatpush3.bf16.msra.mxu1 %v3467_v20  ;;  %v3473_v34 = vld [vmem:[%s4479_s29 + $0x58] sm:$0xff]   ;;  %v3475_v36 = vld [vmem:[%s4479_s29 + $0x60] sm:$0xff]   ;;  %v3477_v32 = vld [vmem:[%s4479_s29 + $0x68] sm:$0xff]   ;;  %v2043_v28 = vor.u32 %v2042_v24, %v2039_v16  ;;  %v2062_v9 = vrot.slane %v2060_v2, 5  ;;  %v2065_v10 = vshrl.u32 %v2925_v5, 16  ;;  %v2068_v13 = vshll.u32 %v2925_v5, 16 }
 0x23b   : > { %3239 = vmatpush3.bf16.msra.mxu0 %v3468_v21  ;;  %3160 = vmatprep.subr.bf16.mxu1 %v3469_v29  ;;  %v3474_v35 = vld [vmem:[%s4479_s29 + $0x118] sm:$0xff]   ;;  %v3476_v37 = vld [vmem:[%s4479_s29 + $0x120] sm:$0xff]   ;;  %v3478_v38 = vld [vmem:[%s4479_s29 + $0x128] sm:$0xff]   ;;  %v2057_v17 = vor.u32 %v2056_v27, %v2053_v25  ;;  %v2082_v23 = vshll.u32 %v2927_v12, 16  ;;  %s3002_s10 = sshll.u32 %s4482_s22, 3  ;;  %s2980_s14 = sshll.u32 %s4483_s23, 4 }
 0x23c   : > { %3240 = vmatprep.subr.bf16.mxu0 %v3470_v22  ;;  %v3479_v40 = vld [vmem:[%s4479_s29 + $0x70] sm:$0xff]   ;;  %v3481_v42 = vld [vmem:[%s4479_s29 + $0x78] sm:$0xff]   ;;  %v3484_v44 = vld [vmem:[%s4479_s29] sm:$0xff]   ;;  %v2044_v15 = vrot.slane %v2043_v28, 4  ;;  %v2067_v21 = vrot.slane %v2065_v10, 4  ;;  %s2698_s12 = sadd.s32 %s3002_s10, %s2980_s14  ;;  %s4484_s22 = sld [smem:[#allocation20_spill]] }
 0x23d   : > { %v3480_v41 = vld [vmem:[%s4479_s29 + $0x130] sm:$0xff]   ;;  %v3482_v43 = vld [vmem:[%s4479_s29 + $0x138] sm:$0xff]   ;;  %v3486_v45 = vld [vmem:[%s4479_s29 + $0x140] sm:$0xff]   ;;  %v2058_v20 = vrot.slane %v2057_v17, 4  ;;  %s2981_s11 = sshll.u32 %s2698_s12, 6  ;;  %s3575_s10 = scalar_lea.vmem %s4376_s27, 512 }
 0x23e   : > { %3161 = vmatpush3.bf16.msra.mxu1 %v3469_v29  ;;  %v3489_v48 = vld [vmem:[%s4479_s29 + $0x8] sm:$0xff]   ;;  %v3491_v51 = vld [vmem:[%s4479_s29 + $0x10] sm:$0xff]   ;;  %v3493_v49 = vld [vmem:[%s4479_s29 + $0x18] sm:$0xff]   ;;  %v2070_v29 = vrot.slane %v2068_v13, 5  ;;  %p3576_p7 = scmp.ne.s32.totalorder %s4376_s27, %s3575_s10  ;;  %s3690_s14 = smov [#allocation8]  }
 0x23f   : > { %3241 = vmatpush3.bf16.msra.mxu0 %v3470_v22  ;;  %3162 = vmatprep.subr.bf16.mxu1 %v3471_v30  ;;  %v3490_v50 = vld [vmem:[%s4479_s29 + $0x148] sm:$0xff]   ;;  %v3492_v53 = vld [vmem:[%s4479_s29 + $0x150] sm:$0xff]   ;;  %v3494_v59 = vld [vmem:[%s4479_s29 + $0x158] sm:$0xff]   ;;  %v2074_v22 = vshll.u32 %v2926_v6, 16  ;;  %s3579_s12 = sshll.u32 %s3690_s14, 4  ;;  %s3580_s12 = int_to_ptr.vmem [resolvable:$false] %s3579_s12 }
 0x240   : > { %3242 = vmatprep.subr.bf16.mxu0 %v3472_v31  ;;  %v3503_v52 = vld [vmem:[#allocation2] ss:$8 sps:$4 sm:$0xff]   ;;  %v2071_v33 = vor.u32 %v2070_v29, %v2067_v21  ;;  %v3499_v39 = vld [vmem:[%s4479_s29 + $0x30] sm:$0xff]   ;;  %p3577_p8 = pnand %p3576_p7, %p3853_p12  ;;  %p3582_p10 = scmp.lt.s32.totalorder %s4376_s27, %s3580_s12 }
 0x241   : > { %v3495_v4 = vld [vmem:[%s4479_s29 + $0x20] sm:$0xff]   ;;  %v3497_v26 = vld [vmem:[%s4479_s29 + $0x28] sm:$0xff]   ;;  %v3510_v58 = vld [vmem:[#allocation2 + $0x10] ss:$8 sps:$4 sm:$0xff]  }
 0x242   : > { %3163 = vmatpush3.bf16.msra.mxu1 %v3471_v30  ;;  %v3496_v11 = vld [vmem:[%s4479_s29 + $0x160] sm:$0xff]   ;;  %v3498_v30 = vld [vmem:[%s4479_s29 + $0x168] sm:$0xff]   ;;  %v3517_v6 = vld [vmem:[%s4479_s29 + $0x90] sm:$0xff]   ;;  %s4485_s15 = smov %s4484_s22  ;;  %s4374_s23 = scalar_lea.hbm %s4484_s22, %s2981_s11 }
 0x243   : > { %3243 = vmatpush3.bf16.msra.mxu0 %v3472_v31  ;;  %3164 = vmatprep.subr.bf16.mxu1 %v3473_v34  ;;  %v2049_v31 = vsel %vm4201_vm11, %v2044_v15, %v2048_v18  ;;  %v3515_v63 = vld [vmem:[%s4479_s29 + $0x88] sm:$0xff]   ;;  %v1279_v18 = vld [vmem:[#allocation2 + $0x18] sm:$0x1f]  ;;  %v3518_v12 = vld [vmem:[%s4479_s29 + $0x190] sm:$0xff]   ;;  %p3578_p9 = pneg %p3577_p8  ;;  %s3581_s11 = scalar_lea.vmem %s3580_s12, 1024 }
 0x244   : > { %3244 = vmatprep.subr.bf16.mxu0 %v3474_v35  ;;  %v3534_v2 = vld [vmem:[#allocation2 + $0x8] ss:$8 sps:$4 sm:$0xff]   ;;  %v2889_v13 = vcombine.low %v1279_v18, %v1279_v18  ;;  %v3519_v15 = vld [vmem:[%s4479_s29 + $0x98] sm:$0xff]   ;;  %p3583_p11 = scmp.lt.s32.totalorder %s3581_s11, %s3575_s10 }
 0x245   : > { %v3516_v14 = vld [vmem:[%s4479_s29 + $0x188] sm:$0xff]  }
 0x246   : > { %3165 = vmatpush3.bf16.msra.mxu1 %v3473_v34  ;;  %v2081_v34 = vrot.slane %v2079_v19, 4  ;;  %v1620_v29 = vshrl.u32 %v2889_v13, 16  ;;  %p3584_p13 = por %p3583_p11, %p3582_p10 }
 0x247   : > { %3245 = vmatpush3.bf16.msra.mxu0 %v3474_v35  ;;  %3166 = vmatprep.subr.bf16.mxu1 %v3475_v36  ;;  %v2084_v35 = vrot.slane %v2082_v23, 5  ;;  %v3520_v23 = vld [vmem:[%s4479_s29 + $0x198] sm:$0xff]  }
 0x248   : > { %3246 = vmatprep.subr.bf16.mxu0 %v3476_v37  ;;  %p3585_p0 = pnand %p3584_p13, %p3578_p9 }
 0x24a   : > { %3167 = vmatpush3.bf16.msra.mxu1 %v3475_v36  ;;  %v2088_v36 = vshll.u32 %v2928_v7, 16 }
 0x24b   : > { %3247 = vmatpush3.bf16.msra.mxu0 %v3476_v37  ;;  %3168 = vmatprep.subr.bf16.mxu1 %v3477_v32  ;;  %v2063_v37 = vsel %vm4201_vm11, %v2058_v20, %v2062_v9  ;;  %v2887_v9 = vcombine.low %v1278_v3, %v1278_v3 }
 0x24c   : > { %3248 = vmatprep.subr.bf16.mxu0 %v3478_v38 }
 0x24d   : > { %v1606_v20 = vshrl.u32 %v2887_v9, 16  ;;  %v1609_v21 = vshll.u32 %v2887_v9, 16 }
 0x24e   : > { %3169 = vmatpush3.bf16.msra.mxu1 %v3477_v32  ;;  %v2929_v32 = vcombine.low %v2049_v31, %v2063_v37  ;;  %v3522_v31 = vld [vmem:[%s4479_s29 + $0x1a0] sm:$0xff]  }
 0x24f   : > { %3249 = vmatpush3.bf16.msra.mxu0 %v3478_v38  ;;  %3170 = vmatprep.subr.bf16.mxu1 %v3479_v40  ;;  %v2085_v38 = vor.u32 %v2084_v35, %v2081_v34  ;;  %v2888_v34 = vcombine.high %v1278_v3, %v1278_v3  ;;  %v2890_v35 = vcombine.high %v1279_v18, %v1279_v18  ;;  %v1611_v37 = vrot.slane %v1609_v21, 5  ;;  %v3548_v3 = vld [vmem:[%s4479_s29 + $0x1e0] sm:$0xff]   ;;  %v3553_v21 = vld [vmem:[%s4479_s29 + $0xf8] sm:$0xff]  }
 0x250   : > { %3250 = vmatprep.subr.bf16.mxu0 %v3480_v41 }
 0x252   : > { %3171 = vmatpush3.bf16.msra.mxu1 %v3479_v40  ;;  %v3500_v40 = vld [vmem:[%s4479_s29 + $0x170] sm:$0xff]  }
 0x253   : > { %3251 = vmatpush3.bf16.msra.mxu0 %v3480_v41  ;;  %3172 = vmatprep.subr.bf16.mxu1 %v3481_v42  ;;  %v2076_v41 = vrot.slane %v2074_v22, 5  ;;  %v1623_v22 = vshll.u32 %v2889_v13, 16  ;;  %v3551_v13 = vld [vmem:[%s4479_s29 + $0xf0] sm:$0xff]  }
 0x254   : > { %3252 = vmatprep.subr.bf16.mxu0 %v3482_v43 }
 0x256   : > { %3173 = vmatpush3.bf16.msra.mxu1 %v3481_v42  ;;  %v2090_v42 = vrot.slane %v2088_v36, 5  ;;  %v1608_v36 = vrot.slane %v1606_v20, 4 }
 0x257   : > { %3253 = vmatpush3.bf16.msra.mxu0 %v3482_v43  ;;  %3178 = vmatprep.subr.bf16.mxu1 %v3484_v44  ;;  %v2072_v43 = vrot.slane %v2071_v33, 4  ;;  %v1625_v33 = vrot.slane %v1623_v22, 5 }
 0x258   : > { %3258 = vmatprep.subr.bf16.mxu0 %v3486_v45 }
 0x259   : > { %3175 = vmatmul.mubr.bf16.vlgmr.msra.gmra.mrb[0].mxu1 %v3487_v46  ;;  %v3502_v46 = vld [vmem:[%s4479_s29 + $0x178] sm:$0xff]  }
 0x25a   : > { %3179 = vmatpush3.bf16.msra.mxu1 %v3484_v44  ;;  %3255 = vmatmul.mubr.bf16.vlgmr.msra.gmra.mrb[0].mxu0 %v3488_v47  ;;  %v2086_v44 = vrot.slane %v2085_v38, 4  ;;  %v3504_v47 = vld [vmem:[%s4479_s29 + $0x80] sm:$0xff]   ;;  %v3523_v38 = vld [vmem:[%s4479_s29 + $0xa8] sm:$0xff]  }
 0x25b   : > { %3259 = vmatpush3.bf16.msra.mxu0 %v3486_v45  ;;  %3180 = vmatprep.subr.bf16.mxu1 %v3489_v48  ;;  %v3501_v45 = vld [vmem:[%s4479_s29 + $0x38] sm:$0xff]  }
 0x25c   : > { %3260 = vmatprep.subr.bf16.mxu0 %v3490_v50  ;;  %3194 = vmatprep.mubr.bf16.mxu1 %v3503_v52  ;;  %v1277_v52 = vld [vmem:[#allocation2 + $0x8] sm:$0x1f] }
 0x25d   : > { %3274 = vmatprep.mubr.bf16.mxu0 %v2929_v32  ;;  %v2885_v56 = vcombine.low %v1277_v52, %v1277_v52  ;;  %v2886_v57 = vcombine.high %v1277_v52, %v1277_v52  ;;  %v1622_v32 = vrot.slane %v1620_v29, 4  ;;  %v3528_v52 = vld [vmem:[%s4479_s29 + $0x1b8] sm:$0xff]  }
 0x25e   : > { %3181 = vmatpush3.bf16.msra.mxu1 %v3489_v48  ;;  %v2077_v48 = vsel %vm4201_vm11, %v2072_v43, %v2076_v41  ;;  %v1629_v41 = vshll.u32 %v2890_v35, 16  ;;  %v3554_v29 = vld [vmem:[%s4479_s29 + $0x1f8] sm:$0xff]   ;;  %v3558_v35 = vld [vmem:[%s4479_s29 + $0x200] sm:$0xff]  }
 0x25f   : > { %3261 = vmatpush3.bf16.msra.mxu0 %v3490_v50  ;;  %3182 = vmatprep.subr.bf16.mxu1 %v3491_v51  ;;  %v2091_v50 = vsel %vm4201_vm11, %v2086_v44, %v2090_v42  ;;  %v1592_v62 = vshrl.u32 %v2885_v56, 16  ;;  %v1595_v0 = vshll.u32 %v2885_v56, 16  ;;  %v1601_v1 = vshll.u32 %v2886_v57, 16  ;;  %v3525_v44 = vld [vmem:[%s4479_s29 + $0xb0] sm:$0xff]   ;;  %v3535_v56 = vld [vmem:[%s4479_s29 + $0x1c0] sm:$0xff]  }
 0x260   : > { %3262 = vmatprep.subr.bf16.mxu0 %v3492_v53  ;;  %v1612_v42 = vor.u32 %v1611_v37, %v1608_v36  ;;  %v1626_v43 = vor.u32 %v1625_v33, %v1622_v32  ;;  %v3556_v32 = vld [vmem:[#allocation4 + $0x10] ss:$8 sps:$4 sm:$0xff]  }
 0x261   : > { %v1594_v25 = vrot.slane %v1592_v62, 4  ;;  %v1603_v28 = vrot.slane %v1601_v1, 5  ;;  %v3543_v62 = vld [vmem:[%s4479_s29 + $0xd0] sm:$0xff]  }
 0x262   : > { %3183 = vmatpush3.bf16.msra.mxu1 %v3491_v51  ;;  %v1276_v51 = vld [vmem:[#allocation2] sm:$0x1f]  ;;  %v1301_v1 = vld [vmem:[#allocation2 + $0x10] sm:$0x1f] }
 0x263   : > { %3263 = vmatpush3.bf16.msra.mxu0 %v3492_v53  ;;  %3184 = vmatprep.subr.bf16.mxu1 %v3493_v49  ;;  %v3509_v53 = vld [vmem:[%s4479_s29 + $0x180] sm:$0xff]   ;;  %v2883_v54 = vcombine.low %v1276_v51, %v1276_v51  ;;  %v2884_v55 = vcombine.high %v1276_v51, %v1276_v51  ;;  %v3527_v51 = vld [vmem:[%s4479_s29 + $0xb8] sm:$0xff]   ;;  %v2962_v18 = vcombine.high %v1301_v1, %v1301_v1 }
 0x264   : > { %3264 = vmatprep.subr.bf16.mxu0 %v3494_v59  ;;  %v3559_v33 = vld [vmem:[#allocation3 + $0xc] sm:$0xff]  }
 0x265   : > { %v1581_v60 = vshll.u32 %v2883_v54, 16  ;;  %v1587_v61 = vshll.u32 %v2884_v55, 16  ;;  %v3533_v55 = vld [vmem:[%s4479_s29 + $0xc0] sm:$0xff]   ;;  %v2519_v20 = vshll.u32 %v2962_v18, 16 }
 0x266   : > { %3185 = vmatpush3.bf16.msra.mxu1 %v3493_v49  ;;  %v2930_v49 = vcombine.low %v2077_v48, %v2091_v50  ;;  %v1613_v48 = vrot.slane %v1612_v42, 4  ;;  %v1627_v50 = vrot.slane %v1626_v43, 4  ;;  %v1303_v42 = vld [vmem:[#allocation2 + $0x20] sm:$0x1f] }
 0x267   : > { %3265 = vmatpush3.bf16.msra.mxu0 %v3494_v59  ;;  %3186 = vmatprep.subr.bf16.mxu1 %v3495_v4  ;;  %v1578_v59 = vshrl.u32 %v2883_v54, 16  ;;  %v1583_v24 = vrot.slane %v1581_v60, 5  ;;  %v1589_v5 = vrot.slane %v1587_v61, 5  ;;  %v3555_v60 = vld [vmem:[#allocation4] ss:$8 sps:$4 sm:$0xff]   ;;  %v3557_v61 = vld [vmem:[#allocation3 + $0x4] sm:$0xff]  }
 0x268   : > { %3266 = vmatprep.subr.bf16.mxu0 %v3496_v11 }
 0x269   : > { %v1580_v16 = vrot.slane %v1578_v59, 4  ;;  %v3542_v59 = vld [vmem:[%s4479_s29 + $0x1c8] sm:$0xff]  }
 0x26a   : > { %3187 = vmatpush3.bf16.msra.mxu1 %v3495_v4  ;;  %v1597_v4 = vrot.slane %v1595_v0, 5  ;;  %v1300_v0 = vld [vmem:[#allocation2 + $0x8] sm:$0x1f] }
 0x26b   : > { %3267 = vmatpush3.bf16.msra.mxu0 %v3496_v11  ;;  %3188 = vmatprep.subr.bf16.mxu1 %v3497_v26  ;;  %v1584_v27 = vor.u32 %v1583_v24, %v1580_v16  ;;  %v2959_v16 = vcombine.low %v1300_v0, %v1300_v0  ;;  %v2961_v24 = vcombine.low %v1301_v1, %v1301_v1 }
 0x26c   : > { %3268 = vmatprep.subr.bf16.mxu0 %v3498_v30  ;;  %v1598_v11 = vor.u32 %v1597_v4, %v1594_v25  ;;  %v3547_v25 = vld [vmem:[%s4479_s29 + $0xe0] sm:$0xff]  }
 0x26d   : > { %v1585_v7 = vrot.slane %v1584_v27, 4  ;;  %v2496_v4 = vshrl.u32 %v2959_v16, 16  ;;  %v2499_v27 = vshll.u32 %v2959_v16, 16 }
 0x26e   : > { %3189 = vmatpush3.bf16.msra.mxu1 %v3497_v26  ;;  %v1599_v17 = vrot.slane %v1598_v11, 4  ;;  %v3549_v11 = vld [vmem:[%s4479_s29 + $0xe8] sm:$0xff]  }
 0x26f   : > { %3269 = vmatpush3.bf16.msra.mxu0 %v3498_v30  ;;  %3190 = vmatprep.subr.bf16.mxu1 %v3499_v39  ;;  %v1590_v10 = vsel %vm4201_vm11, %v1585_v7, %v1589_v5  ;;  %v3521_v30 = vld [vmem:[%s4479_s29 + $0xa0] sm:$0xff]   ;;  %v2510_v5 = vshrl.u32 %v2961_v24, 16  ;;  %v2498_v7 = vrot.slane %v2496_v4, 4 }
 0x270   : > { %3270 = vmatprep.subr.bf16.mxu0 %v3500_v40  ;;  %v1604_v19 = vsel %vm4201_vm11, %v1599_v17, %v1603_v28  ;;  %v2960_v28 = vcombine.high %v1300_v0, %v1300_v0  ;;  %v2501_v17 = vrot.slane %v2499_v27, 5 }
 0x271   : > { %v2891_v26 = vcombine.low %v1590_v10, %v1604_v19  ;;  %v2512_v9 = vrot.slane %v2510_v5, 4 }
 0x272   : > { %3191 = vmatpush3.bf16.msra.mxu1 %v3499_v39  ;;  %v3524_v39 = vld [vmem:[%s4479_s29 + $0x1a8] sm:$0xff]   ;;  %v2502_v19 = vor.u32 %v2501_v17, %v2498_v7 }
 0x273   : > { %3271 = vmatpush3.bf16.msra.mxu0 %v3500_v40  ;;  %3192 = vmatprep.subr.bf16.mxu1 %v3501_v45  ;;  %v1615_v40 = vshll.u32 %v2888_v34, 16  ;;  %v2521_v34 = vrot.slane %v2519_v20, 5 }
 0x274   : > { %3272 = vmatprep.subr.bf16.mxu0 %v3502_v46  ;;  %v2503_v22 = vrot.slane %v2502_v19, 4 }
 0x276   : > { %3193 = vmatpush3.bf16.msra.mxu1 %v3501_v45  ;;  %v3526_v45 = vld [vmem:[%s4479_s29 + $0x1b0] sm:$0xff]  }
 0x277   : > { %3273 = vmatpush3.bf16.msra.mxu0 %v3502_v46  ;;  %3198 = vmatprep.subr.bf16.mxu1 %v3504_v47  ;;  %v1617_v46 = vrot.slane %v1615_v40, 5  ;;  %v3561_v40 = vld [vmem:[%s4479_s29 + $0x210] sm:$0xff]  }
 0x278   : > { %3278 = vmatprep.subr.bf16.mxu0 %v3509_v53 }
 0x279   : > { %3195 = vmatmul.mubr.bf16.vlgmr.msra.gmra.mrb[0].mxu1 %v3510_v58  ;;  %v3540_v58 = vld [vmem:[#allocation2 + $0x18] ss:$8 sps:$4 sm:$0xff]  }
 0x27a   : > { %3199 = vmatpush3.bf16.msra.mxu1 %v3504_v47  ;;  %3275 = vmatmul.mubr.bf16.vlgmr.msra.gmra.mrb[0].mxu0 %v2930_v49  ;;  %v1631_v47 = vrot.slane %v1629_v41, 5  ;;  %v3541_v49 = vld [vmem:[%s4479_s29 + $0xc8] sm:$0xff]   ;;  %v1302_v41 = vld [vmem:[#allocation2 + $0x18] sm:$0x1f] }
 0x27b   : > { %3279 = vmatpush3.bf16.msra.mxu0 %v3509_v53  ;;  %3200 = vmatprep.subr.bf16.mxu1 %v3515_v63  ;;  %v1618_v53 = vsel %vm4201_vm11, %v1613_v48, %v1617_v46  ;;  %v2963_v43 = vcombine.low %v1302_v41, %v1302_v41 }
 0x27c   : > { %3280 = vmatprep.subr.bf16.mxu0 %v3516_v14  ;;  %3294 = vmatprep.mubr.bf16.mxu0 %v3534_v2  ;;  %v1632_v54 = vsel %vm4201_vm11, %v1627_v50, %v1631_v47  ;;  %v3545_v2 = vld [vmem:[%s4479_s29 + $0xd8] sm:$0xff]  }
 0x27d   : > { %3214 = vmatprep.mubr.bf16.mxu1 %v2891_v26  ;;  %v2892_v57 = vcombine.low %v1618_v53, %v1632_v54  ;;  %v2524_v46 = vshrl.u32 %v2963_v43, 16  ;;  %v2527_v47 = vshll.u32 %v2963_v43, 16  ;;  %v2966_v53 = vcombine.high %v1303_v42, %v1303_v42 }
 0x27e   : > { %3201 = vmatpush3.bf16.msra.mxu1 %v3515_v63  ;;  %v3544_v63 = vld [vmem:[%s4479_s29 + $0x1d0] sm:$0xff]  }
 0x27f   : > { %3281 = vmatpush3.bf16.msra.mxu0 %v3516_v14  ;;  %3202 = vmatprep.subr.bf16.mxu1 %v3517_v6  ;;  %v3546_v14 = vld [vmem:[%s4479_s29 + $0x1d8] sm:$0xff]   ;;  %v2526_v54 = vrot.slane %v2524_v46, 4 }
 0x280   : > { %3282 = vmatprep.subr.bf16.mxu0 %v3518_v12 }
 0x282   : > { %3203 = vmatpush3.bf16.msra.mxu1 %v3517_v6  ;;  %v2513_v6 = vshll.u32 %v2961_v24, 16 }
 0x283   : > { %3283 = vmatpush3.bf16.msra.mxu0 %v3518_v12  ;;  %3204 = vmatprep.subr.bf16.mxu1 %v3519_v15  ;;  %v3550_v12 = vld [vmem:[%s4479_s29 + $0x1e8] sm:$0xff]  }
 0x284   : > { %3284 = vmatprep.subr.bf16.mxu0 %v3520_v23  ;;  %v2515_v10 = vrot.slane %v2513_v6, 5 }
 0x286   : > { %3205 = vmatpush3.bf16.msra.mxu1 %v3519_v15  ;;  %v3552_v15 = vld [vmem:[%s4479_s29 + $0x1f0] sm:$0xff]   ;;  %v2516_v26 = vor.u32 %v2515_v10, %v2512_v9 }
 0x287   : > { %3285 = vmatpush3.bf16.msra.mxu0 %v3520_v23  ;;  %3206 = vmatprep.subr.bf16.mxu1 %v3521_v30  ;;  %v2505_v23 = vshll.u32 %v2960_v28, 16 }
 0x288   : > { %3286 = vmatprep.subr.bf16.mxu0 %v3522_v31 }
 0x28a   : > { %3207 = vmatpush3.bf16.msra.mxu1 %v3521_v30  ;;  %v2507_v30 = vrot.slane %v2505_v23, 5 }
 0x28b   : > { %3287 = vmatpush3.bf16.msra.mxu0 %v3522_v31  ;;  %3208 = vmatprep.subr.bf16.mxu1 %v3523_v38  ;;  %v2517_v31 = vrot.slane %v2516_v26, 4 }
 0x28c   : > { %3288 = vmatprep.subr.bf16.mxu0 %v3524_v39  ;;  %v2508_v36 = vsel %vm4201_vm11, %v2503_v22, %v2507_v30 }
 0x28d   : > { %v2522_v37 = vsel %vm4201_vm11, %v2517_v31, %v2521_v34 }
 0x28e   : > { %3209 = vmatpush3.bf16.msra.mxu1 %v3523_v38  ;;  %v2967_v38 = vcombine.low %v2508_v36, %v2522_v37 }
 0x28f   : > { %3289 = vmatpush3.bf16.msra.mxu0 %v3524_v39  ;;  %3210 = vmatprep.subr.bf16.mxu1 %v3525_v44  ;;  %v3560_v39 = vld [vmem:[%s4479_s29 + $0x208] sm:$0xff]  }
 0x290   : > { %3290 = vmatprep.subr.bf16.mxu0 %v3526_v45 }
 0x292   : > { %3211 = vmatpush3.bf16.msra.mxu1 %v3525_v44  ;;  %v2965_v44 = vcombine.low %v1303_v42, %v1303_v42 }
 0x293   : > { %3291 = vmatpush3.bf16.msra.mxu0 %v3526_v45  ;;  %3212 = vmatprep.subr.bf16.mxu1 %v3527_v51  ;;  %v3562_v45 = vld [vmem:[%s4479_s29 + $0x218] sm:$0xff]  }
 0x294   : > { %3292 = vmatprep.subr.bf16.mxu0 %v3528_v52  ;;  %v2538_v48 = vshrl.u32 %v2965_v44, 16  ;;  %v2541_v50 = vshll.u32 %v2965_v44, 16 }
 0x296   : > { %3213 = vmatpush3.bf16.msra.mxu1 %v3527_v51  ;;  %v3563_v51 = vld [vmem:[%s4479_s29 + $0x220] sm:$0xff]  }
 0x297   : > { %3293 = vmatpush3.bf16.msra.mxu0 %v3528_v52  ;;  %3218 = vmatprep.subr.bf16.mxu1 %v3533_v55  ;;  %v2964_v52 = vcombine.high %v1302_v41, %v1302_v41 }
 0x298   : > { %3298 = vmatprep.subr.bf16.mxu0 %v3535_v56 }
 0x299   : > { %3215 = vmatmul.mubr.bf16.vlgmr.msra.gmra.mrb[0].mxu1 %v2892_v57  ;;  %v2543_v57 = vrot.slane %v2541_v50, 5 }
 0x29a   : > { %3219 = vmatpush3.bf16.msra.mxu1 %v3533_v55  ;;  %3295 = vmatmul.mubr.bf16.vlgmr.msra.gmra.mrb[0].mxu0 %v3540_v58  ;;  %v2529_v55 = vrot.slane %v2527_v47, 5  ;;  %v3564_v58 = vld [vmem:[%s4479_s29 + $0x228] sm:$0xff]  }
 0x29b   : > { %3299 = vmatpush3.bf16.msra.mxu0 %v3535_v56  ;;  %3220 = vmatprep.subr.bf16.mxu1 %v3541_v49  ;;  %v2540_v56 = vrot.slane %v2538_v48, 4 }
 0x29c   : > { %3300 = vmatprep.subr.bf16.mxu0 %v3542_v59  ;;  %3234 = vmatprep.mubr.bf16.mxu1 %v3555_v60 }
 0x29d   : > { %3314 = vmatprep.mubr.bf16.mxu0 %v3557_v61  ;;  %v2544_v60 = vor.u32 %v2543_v57, %v2540_v56  ;;  %v2547_v61 = vshll.u32 %v2966_v53, 16 }
 0x29e   : > { %3221 = vmatpush3.bf16.msra.mxu1 %v3541_v49  ;;  %v2530_v49 = vor.u32 %v2529_v55, %v2526_v54 }
 0x29f   : > { %3301 = vmatpush3.bf16.msra.mxu0 %v3542_v59  ;;  %3222 = vmatprep.subr.bf16.mxu1 %v3543_v62  ;;  %v2533_v59 = vshll.u32 %v2964_v52, 16  ;;  %v2545_v1 = vrot.slane %v2544_v60, 4 }
 0x2a0   : > { %3302 = vmatprep.subr.bf16.mxu0 %v3544_v63 }
 0x2a1   : > { %v2535_v0 = vrot.slane %v2533_v59, 5 }
 0x2a2   : > { %3223 = vmatpush3.bf16.msra.mxu1 %v3543_v62  ;;  %v3565_v62 = vld [vmem:[%s4479_s29 + $0x230] sm:$0xff]  }
 0x2a3   : > { %3303 = vmatpush3.bf16.msra.mxu0 %v3544_v63  ;;  %3224 = vmatprep.subr.bf16.mxu1 %v3545_v2  ;;  %v2531_v63 = vrot.slane %v2530_v49, 4 }
 0x2a4   : > { %3304 = vmatprep.subr.bf16.mxu0 %v3546_v14 }
 0x2a5   : > { %v2536_v16 = vsel %vm4201_vm11, %v2531_v63, %v2535_v0 }
 0x2a6   : > { %3225 = vmatpush3.bf16.msra.mxu1 %v3545_v2  ;;  %v2549_v2 = vrot.slane %v2547_v61, 5 }
 0x2a7   : > { %3305 = vmatpush3.bf16.msra.mxu0 %v3546_v14  ;;  %3226 = vmatprep.subr.bf16.mxu1 %v3547_v25  ;;  %v3566_v14 = vld [vmem:[%s4479_s29 + $0x238] sm:$0xff]  }
 0x2a8   : > { %3306 = vmatprep.subr.bf16.mxu0 %v3548_v3  ;;  %v2550_v24 = vsel %vm4201_vm11, %v2545_v1, %v2549_v2 }
 0x2aa   : > { %3227 = vmatpush3.bf16.msra.mxu1 %v3547_v25  ;;  %v2968_v25 = vcombine.low %v2536_v16, %v2550_v24 }
 0x2ab   : > { %3307 = vmatpush3.bf16.msra.mxu0 %v3548_v3  ;;  %3228 = vmatprep.subr.bf16.mxu1 %v3549_v11 }
 0x2ac   : > { %3308 = vmatprep.subr.bf16.mxu0 %v3550_v12 }
 0x2ae   : > { %3229 = vmatpush3.bf16.msra.mxu1 %v3549_v11 }
 0x2af   : > { %3309 = vmatpush3.bf16.msra.mxu0 %v3550_v12  ;;  %3230 = vmatprep.subr.bf16.mxu1 %v3551_v13 }
 0x2b0   : > { %3310 = vmatprep.subr.bf16.mxu0 %v3552_v15 }
 0x2b2   : > { %3231 = vmatpush3.bf16.msra.mxu1 %v3551_v13 }
 0x2b3   : > { %3311 = vmatpush3.bf16.msra.mxu0 %v3552_v15  ;;  %3232 = vmatprep.subr.bf16.mxu1 %v3553_v21 }
 0x2b4   : > { %3312 = vmatprep.subr.bf16.mxu0 %v3554_v29 }
 0x2b6   : > { %3233 = vmatpush3.bf16.msra.mxu1 %v3553_v21 }
 0x2b7   : > { %3313 = vmatpush3.bf16.msra.mxu0 %v3554_v29 }
 0x2b8   : > { %3318 = vmatprep.subr.bf16.mxu0 %v3558_v35 }
 0x2b9   : > { %3235 = vmatmul.mubr.bf16.vlgmr.msra.gmra.mrb[0].mxu1 %v3556_v32 }
 0x2ba   : > { %3315 = vmatmul.mubr.bf16.vlgmr.msra.gmra.mrb[0].mxu0 %v3559_v33 }
 0x2bb   : > { %3319 = vmatpush3.bf16.msra.mxu0 %v3558_v35  ;;  %3334 = vmatprep.mubr.bf16.mxu0 %v2967_v38 }
 0x2bc   : > { %3320 = vmatprep.subr.bf16.mxu0 %v3560_v39 }
 0x2bf   : > { %3321 = vmatpush3.bf16.msra.mxu0 %v3560_v39 }
 0x2c0   : > { %3322 = vmatprep.subr.bf16.mxu0 %v3561_v40 }
 0x2c3   : > { %3323 = vmatpush3.bf16.msra.mxu0 %v3561_v40 }
 0x2c4   : > { %3324 = vmatprep.subr.bf16.mxu0 %v3562_v45 }
 0x2c7   : > { %3325 = vmatpush3.bf16.msra.mxu0 %v3562_v45 }
 0x2c8   : > { %3326 = vmatprep.subr.bf16.mxu0 %v3563_v51 }
 0x2cb   : > { %3327 = vmatpush3.bf16.msra.mxu0 %v3563_v51 }
 0x2cc   : > { %3328 = vmatprep.subr.bf16.mxu0 %v3564_v58 }
 0x2cf   : > { %3329 = vmatpush3.bf16.msra.mxu0 %v3564_v58 }
 0x2d0   : > { %3330 = vmatprep.subr.bf16.mxu0 %v3565_v62 }
 0x2d3   : > { %3331 = vmatpush3.bf16.msra.mxu0 %v3565_v62 }
 0x2d4   : > { %3332 = vmatprep.subr.bf16.mxu0 %v3566_v14 }
 0x2d7   : > { %3333 = vmatpush3.bf16.msra.mxu0 %v3566_v14 }
 0x2da   : > { %3335 = vmatmul.mubr.bf16.vlgmr.msra.gmra.mrb[0].mxu0 %v2968_v25 }
 0x38c   : > { %v3236_v3 = vpop.f32.mrb[0].mxu1 }
 0x38d   : > { %v1868_v4 = vpop.f32.mrb[1].mxu1 }
 0x38e   : > { %v3237_v27 = vpop.f32.mrb[2].mxu1 }
 0x38f   : > { %v1871_v5 = vpop.f32.mrb[3].mxu1 }
 0x3ad   : > { %v3336_v6 = vpop.f32.mrb[0].mxu0 }
 0x3ae   : > { %v3340_v11 = vadd.f32 %v3336_v6, %v3236_v3  ;;  %v2657_v28 = vpop.f32.mrb[1].mxu0 }
 0x3af   : > { %v3341_v8 = vadd.f32 %v2657_v28, %v1868_v4  ;;  %v3337_v18 = vpop.f32.mrb[2].mxu0 }
 0x3b0   : > { %v2678_v12 = vpack.c.bf16 %v3340_v11, %v3340_v11  ;;  %v3342_v7 = vadd.f32 %v3337_v18, %v3237_v27  ;;  %v2660_v17 = vpop.f32.mrb[3].mxu0 }
 0x3b1   : > { %v2676_v9 = vpack.c.bf16 %v3341_v8, %v3341_v8  ;;  %v3343_v10 = vadd.f32 %v2660_v17, %v1871_v5 }
 0x3b2   : > { %2682 = vst [vmem:[%s4045_s18 + $0x14] sm:$0xf] %v2678_v12  ;;  %v2679_v13 = vpack.c.bf16 %v3342_v7, %v3342_v7 }
 0x3b3   : > { %2680 = vst [vmem:[%s4045_s18 + $0x4] sm:$0xf] %v2676_v9  ;;  %v2677_v15 = vpack.c.bf16 %v3343_v10, %v3343_v10 }
 0x3b4   : > { %2683 = vst [vmem:[%s4045_s18 + $0x1c] sm:$0xf] %v2679_v13 }
 0x3b5   : > { %2681 = vst [vmem:[%s4045_s18 + $0xc] sm:$0xf] %v2677_v15 }
 0x3b6   : > { %3588 = shalt.err (!%p3585_p0)
}
 0x3b7   : > { %s3589_s18 = scalar_lea.hbm %s4374_s23, 512  ;;  %s3593_s22 = scalar_lea.hbm %s4485_s15, 2048 }
 0x3b8   : > { %p3590_p2 = scmp.ne.s32.totalorder %s4374_s23, %s3589_s18  ;;  %p3594_p5 = scmp.lt.u32.totalorder %s4374_s23, %s4485_s15 }
 0x3b9   : > { %p3595_p6 = scmp.lt.u32.totalorder %s3593_s22, %s3589_s18  ;;  %p3597_p8 = scmp.lt.u32.totalorder %s3589_s18, %s4374_s23 }
 0x3ba   : > { %p3591_p1 = pnand %p3590_p2, %p3853_p12 }
 0x3bb   : > { %p3596_p7 = por %p3595_p6, %p3594_p5 }
 0x3bc   : > { %p3592_p3 = pneg %p3591_p1 }
 0x3bd   : > { %p3598_p9 = por %p3597_p8, %p3596_p7 }
 0x3bf   : > { %p3599_p10 = pnand %p3598_p9, %p3592_p3 }
 0x3c1   : > { %3602 = shalt.err (!%p3599_p10)
}
 0x3c2   : > { %s3691_s10 = smov 128   ;;  %s3692_s11 = smov 8  }
 0x3c3   : > { %3375 = dma.vmem_to_hbm [thread:$0]  (%p3853_p12), %s4376_s27, 512, %s4374_s23, %s2685_s17, %s3691_s10, %s3691_s10, %s3692_s11  }
 0x3c4 PF: > { %s4486_s30 = sld [smem:[#allocation11_spill]]  ;;  %p3381_p11 = scmp.ge.s32.totalorder %s3685_s26, 2 }
 0x3c6   : > { %p3378_p13 = pnand %p3381_p11, %p3862_p4 }
 0x3ca   : > { %s2716_s22 = sand.u32 1, %s4486_s30  }
 0x3cb   : > { %s2717_s18 = scalar_lea.sflag [#allocation9], %s2716_s22 }
 0x3cc   : > { %3644 = dma.done.wait (!%p3378_p13), %s2717_s18, 512  }
 0x3cd   : > { %3646 = vsyncadd (!%p3378_p13), %s2717_s18, 4294966784  ;;  %s24_s26 = sadd.s32 1, %s3685_s26   ;;  %s4488_s14 = sld [smem:[#allocation17_spill]] }
 0x3ce   : > { %p21_p0 = scmp.ge.s32.totalorder %s24_s26, 6   ;;  %s4489_s13 = sld [smem:[#allocation16_spill]] }
 0x3cf   : > { %s4490_s16 = sld [smem:[#allocation14_spill]]  ;;  %s4491_s27 = sld [smem:[#allocation15_spill]] }
 0x3d0   : > { %s4492_s17 = smov %s3661_s20  ;;  %s4493_s18 = smov %s3657_s19 }
 0x3d1   : > { %s4495_s20 = smov %s3665_s21  ;;  %s4497_s22 = smov %s3677_s24 }
 0x3d2   : > { %s4498_s23 = smov %s3681_s25  ;;  %23 = sbr.rel (!%p21_p0) target bundleno = 9 (0x9), region = 200 }
 0x3d3   : > { %s4494_s19 = smov %s4488_s14 }
 0x3d4   : > { %s4496_s21 = smov %s4489_s13 }
 0x3d5   : > { %s4499_s24 = smov %s4490_s16  ;;  %s4500_s25 = smov %s4491_s27 }
 0x3d9   :  { %2722 = vsyncpa [#allocation9], 1 }
 0x3da   :  { %2724 = vsyncpa [#allocation9 + $0x1], 1 }

</bundles_post_ra>
